<compile_context>
chip_gen: v7x
topology: tpu7x:2x2x1
jax: 0.10.0
libtpu: 0.0.40
codegen_flags: <defaults>
</compile_context>

<pallas_src>
from functools import partial

import jax
import jax.numpy as jnp
import numpy as np
from jax import lax
from jax.experimental import pallas as pl
from jax.experimental.pallas import tpu as pltpu

_LANE = 128     # vreg lane width
_HALO_W = 128   # left-context lanes kept per chunk window (only the last K are read)


def _sdn_kernel(x_ref, halo_ref, wts_ref, o_ref, xwin_ref, obuf_ref, *, D, K, chunk):
    """One (batch-block, L-tile) grid step.

    x_ref    : (TILE_B, TILE_L)                  input slab (VMEM)
    halo_ref : (TILE_B, HW_BLK)                  lanes just before this tile (VMEM)
    wts_ref  : (D*K + D + D*D + D + D + 1,)      packed weights/biases (SMEM)
    o_ref    : (TILE_B, TILE_L)                  output slab (VMEM)
    xwin_ref : (N_CHUNKS, TILE_B, 128 + chunk)   per-chunk windows (VMEM scratch)
    obuf_ref : (N_CHUNKS, TILE_B, chunk)         per-chunk outputs (VMEM scratch)
    """
    l = pl.program_id(1)
    tile_b, tile_l = x_ref.shape
    n_chunks = tile_l // chunk
    hw = _HALO_W
    hwb = halo_ref.shape[-1]

    # ---- scalar weights from SMEM (hoisted out of the chunk loop) -------------
    o_wsp = 0
    o_bsp = o_wsp + D * K
    o_wft = o_bsp + D
    o_bft = o_wft + D * D
    o_wdec = o_bft + D
    o_bdec = o_wdec + D
    w_sp = [[wts_ref[o_wsp + d * K + k] for k in range(K)] for d in range(D)]
    b_sp = [wts_ref[o_bsp + d] for d in range(D)]
    w_ft = [[wts_ref[o_wft + c * D + d] for d in range(D)] for c in range(D)]
    b_ft = [wts_ref[o_bft + c] for c in range(D)]
    w_dec = [wts_ref[o_wdec + d] for d in range(D)]
    b_dec = wts_ref[o_bdec]

    # ---- assemble per-chunk windows: [128-lane left context | chunk lanes] ----
    # All lane offsets are multiples of 128 (aligned stores); dynamic indexing
    # later only touches the leading (chunk) dimension of the scratch.
    @pl.when(l == 0)
    def _():  # left zero-padding of the padding=K convolution
        xwin_ref[0, :, :hw] = jnp.zeros((tile_b, hw), jnp.float32)

    @pl.when(l > 0)
    def _():  # last lanes of the previous L-tile of these rows
        xwin_ref[0, :, hw - hwb:hw] = halo_ref[...]

    xwin_ref[0, :, hw:] = x_ref[:, 0:chunk]
    for ci in range(1, n_chunks):
        base = ci * chunk
        xwin_ref[ci, :, :hw] = x_ref[:, base - hw:base]
        xwin_ref[ci, :, hw:] = x_ref[:, base:base + chunk]

    # ---- per-chunk compute: all TILE_B rows at once, channels via VPU MACs ----
    def chunk_body(ci, carry):
        wv = xwin_ref[ci]                                   # (TILE_B, 128 + chunk)

        # Spatial layer: h[d, t] = relu(b_sp[d] + sum_k w_sp[d, k] * x[t - K + k])
        h = [jnp.full((tile_b, chunk), b_sp[d], jnp.float32) for d in range(D)]
        for k in range(K):
            xs = wv[:, hw - K + k: hw - K + k + chunk]      # lane-shifted window
            for d in range(D):
                h[d] = h[d] + xs * w_sp[d][k]
        h = [jnp.maximum(v, 0.0) for v in h]

        # Feature layer (1x1 conv + residual + relu) fused with the D->1 decoder.
        y = jnp.full((tile_b, chunk), b_dec, jnp.float32)
        for c in range(D):
            f = jnp.full((tile_b, chunk), b_ft[c], jnp.float32)
            for d in range(D):
                f = f + h[d] * w_ft[c][d]
            f = jnp.maximum(f + h[c], 0.0)
            y = y + f * w_dec[c]

        obuf_ref[ci] = y
        return carry

    lax.fori_loop(0, n_chunks, chunk_body, 0)

    # ---- lane-dense output writeback (static, aligned lane offsets) ----------
    for ci in range(n_chunks):
        o_ref[:, ci * chunk:(ci + 1) * chunk] = obuf_ref[ci]


def fused_sdn_forward(x, params, *, max_tile_l=16384, chunk=512):
    """x: (B, 1, L) float32  ->  decoder output with PyTorch .squeeze() semantics."""
    w_sp, b_sp, w_ft, b_ft, w_dec, b_dec = params
    B, c_in, L = x.shape
    assert c_in == 1, "forward path with defaults uses a single Conv1d(1, D, K) layer"
    D, K = w_sp.shape
    assert K <= _HALO_W

    def round_up(a, m):
        return (a + m - 1) // m * m

    # L tiling: lane-dense (multiple of 128) and as large as allowed so the per-step
    # pipeline overhead is amortized over a large HBM slab.
    chunk = max(_LANE, round_up(chunk, _LANE))
    max_tile_l = max(chunk, round_up(max_tile_l, chunk))
    if L <= _LANE:
        tile_l = L                                  # block == full dim (always legal)
    elif round_up(L, _LANE) <= chunk:
        tile_l = round_up(L, _LANE)
    else:
        tile_l = min(max_tile_l, round_up(L, chunk))
    chunk_eff = min(chunk, tile_l)                  # tile_l % chunk_eff == 0
    n_chunks = tile_l // chunk_eff
    num_l_tiles = pl.cdiv(L, tile_l)

    # Batch blocking: 8 rows per step -> full-sublane vregs and full-tile DMAs.
    tile_b = 8 if B >= 8 else B
    num_b_tiles = pl.cdiv(B, tile_b)

    x2 = x.reshape(B, L).astype(jnp.float32)
    packed_wts = jnp.concatenate([
        w_sp.reshape(-1), b_sp.reshape(-1), w_ft.reshape(-1),
        b_ft.reshape(-1), w_dec.reshape(-1), b_dec.reshape(-1),
    ]).astype(jnp.float32)

    # Left-halo view of x: the lanes just before this tile.  Only read for l > 0
    # (which implies tile_l >= 128, i.e. halo_w_blk == 128); for l == 0 the kernel
    # substitutes the conv's zero padding, so the clamped block-0 content is unused.
    halo_w_blk = _HALO_W if tile_l >= _HALO_W else tile_l
    n_halo_blocks = tile_l // halo_w_blk

    kernel = partial(_sdn_kernel, D=D, K=K, chunk=chunk_eff)

    out = pl.pallas_call(
        kernel,
        out_shape=jax.ShapeDtypeStruct((B, L), jnp.float32),
        grid=(num_b_tiles, num_l_tiles),
        in_specs=[
            pl.BlockSpec((tile_b, tile_l), lambda b, l: (b, l)),
            pl.BlockSpec((tile_b, halo_w_blk),
                         lambda b, l: (b, jnp.maximum(l * n_halo_blocks - 1, 0))),
            pl.BlockSpec(memory_space=pltpu.MemorySpace.SMEM),   # packed weights
        ],
        out_specs=pl.BlockSpec((tile_b, tile_l), lambda b, l: (b, l)),
        scratch_shapes=[
            pltpu.VMEM((n_chunks, tile_b, _HALO_W + chunk_eff), jnp.float32),
            pltpu.VMEM((n_chunks, tile_b, chunk_eff), jnp.float32),
        ],
        compiler_params=pltpu.CompilerParams(
            dimension_semantics=("parallel", "parallel")),
    )(x2, x2, packed_wts)
    return jnp.squeeze(out)   # matches PyTorch .squeeze()


def reference(x, params):
    """Pure-JAX reference matching the PyTorch forward."""
    w_sp, b_sp, w_ft, b_ft, w_dec, b_dec = params
    B, _, L = x.shape
    D, K = w_sp.shape
    hi = jax.lax.Precision.HIGHEST
    rhs = w_sp[:, None, :]                                        # (O=D, I=1, K)
    dn = lax.conv_dimension_numbers(x.shape, rhs.shape, ('NCH', 'OIH', 'NCH'))
    h = lax.conv_general_dilated(x, rhs, window_strides=(1,), padding=[(K, K)],
                                 dimension_numbers=dn, precision=hi)
    h = h[..., :L] + b_sp[None, :, None]                          # trunc + bias
    h = jnp.maximum(h, 0.0)
    f = jnp.einsum('cd,bdl->bcl', w_ft, h, precision=hi) + b_ft[None, :, None]
    h = jnp.maximum(f + h, 0.0)
    out = jnp.einsum('od,bdl->bol', w_dec, h, precision=hi) + b_dec[None, :, None]
    return out.squeeze()


def make_params(key, d_model=8, kernel_size=8):
    D, K = d_model, kernel_size
    ks = jax.random.split(key, 6)

    def u(k, shape, fan_in):
        bound = 1.0 / np.sqrt(fan_in)
        return jax.random.uniform(k, shape, jnp.float32, -bound, bound)

    w_sp = u(ks[0], (D, K), 1 * K)      # Conv1d(1, D, K) weight, in-channel squeezed
    b_sp = u(ks[1], (D,), 1 * K)
    w_ft = u(ks[2], (D, D), D)          # Conv1d(D, D, 1) weight, kernel dim squeezed
    b_ft = u(ks[3], (D,), D)
    w_dec = u(ks[4], (1, D), D)         # Conv1d(D, 1, 1) weight
    b_dec = u(ks[5], (1,), D)
    return (w_sp, b_sp, w_ft, b_ft, w_dec, b_dec)


if __name__ == "__main__":
    d_model, kernel_size = 8, 8
    key = jax.random.PRNGKey(0)
    k_params, k_x1, k_x2 = jax.random.split(key, 3)
    params = make_params(k_params, d_model, kernel_size)

    # 1) Module-default small shape (single tile, single chunk).
    B, L = 2, 16
    x = jax.random.normal(k_x1, (B, 1, L), jnp.float32)
    y = jax.block_until_ready(fused_sdn_forward(x, params))
    y_ref = jax.block_until_ready(reference(x, params))
    assert y.shape == (B, L), y.shape
    np.testing.assert_allclose(np.asarray(y), np.asarray(y_ref), rtol=1e-3, atol=1e-5)

    # 2) Tiled path check: multiple L-tiles (halo across tiles), partial batch block,
    #    partial last lane tile.  max_tile_l is forced small to exercise the halo.
    B2, L2 = 9, 1200
    x2 = jax.random.normal(k_x2, (B2, 1, L2), jnp.float32)
    y2 = jax.block_until_ready(fused_sdn_forward(x2, params, max_tile_l=512))
    y2_ref = jax.block_until_ready(reference(x2, params))
    assert y2.shape == (B2, L2), y2.shape
    np.testing.assert_allclose(np.asarray(y2), np.asarray(y2_ref), rtol=1e-3, atol=1e-5)

    print("KERNEL_OK")
</pallas_src>

<mosaic_0001>
module attributes {stable_mosaic.version = 11 : i64} {
  func.func @_sdn_kernel(%arg0: i32, %arg1: i32, %arg2: memref<2x16xf32, #tpu.memory_space<vmem>>, %arg3: memref<2x16xf32, #tpu.memory_space<vmem>>, %arg4: memref<153xf32, #tpu.memory_space<smem>>, %arg5: memref<2x16xf32, #tpu.memory_space<vmem>>, %arg6: memref<1x2x144xf32, #tpu.memory_space<vmem>>, %arg7: memref<1x2x16xf32, #tpu.memory_space<vmem>>) attributes {dimension_semantics = [#tpu.dimension_semantics<parallel>, #tpu.dimension_semantics<parallel>], iteration_bounds = array<i64: 1, 1>, scalar_prefetch = 0 : i64, scratch_operands = 2 : i64, tpu.core_type = #tpu.core_type<tc>, window_params = [{transform_indices = @transform_0, window_bounds = array<i64: 2, 16>}, {transform_indices = @transform_1, window_bounds = array<i64: 2, 16>}, {transform_indices = @transform_2, window_bounds = array<i64: 153>}, {transform_indices = @transform_3, window_bounds = array<i64: 2, 16>}]} {
    %c0 = arith.constant 0 : index
    %0 = memref.load %arg4[%c0] : memref<153xf32, #tpu.memory_space<smem>>
    %c1 = arith.constant 1 : index
    %1 = memref.load %arg4[%c1] : memref<153xf32, #tpu.memory_space<smem>>
    %c2 = arith.constant 2 : index
    %2 = memref.load %arg4[%c2] : memref<153xf32, #tpu.memory_space<smem>>
    %c3 = arith.constant 3 : index
    %3 = memref.load %arg4[%c3] : memref<153xf32, #tpu.memory_space<smem>>
    %c4 = arith.constant 4 : index
    %4 = memref.load %arg4[%c4] : memref<153xf32, #tpu.memory_space<smem>>
    %c5 = arith.constant 5 : index
    %5 = memref.load %arg4[%c5] : memref<153xf32, #tpu.memory_space<smem>>
    %c6 = arith.constant 6 : index
    %6 = memref.load %arg4[%c6] : memref<153xf32, #tpu.memory_space<smem>>
    %c7 = arith.constant 7 : index
    %7 = memref.load %arg4[%c7] : memref<153xf32, #tpu.memory_space<smem>>
    %c8 = arith.constant 8 : index
    %8 = memref.load %arg4[%c8] : memref<153xf32, #tpu.memory_space<smem>>
    %c9 = arith.constant 9 : index
    %9 = memref.load %arg4[%c9] : memref<153xf32, #tpu.memory_space<smem>>
    %c10 = arith.constant 10 : index
    %10 = memref.load %arg4[%c10] : memref<153xf32, #tpu.memory_space<smem>>
    %c11 = arith.constant 11 : index
    %11 = memref.load %arg4[%c11] : memref<153xf32, #tpu.memory_space<smem>>
    %c12 = arith.constant 12 : index
    %12 = memref.load %arg4[%c12] : memref<153xf32, #tpu.memory_space<smem>>
    %c13 = arith.constant 13 : index
    %13 = memref.load %arg4[%c13] : memref<153xf32, #tpu.memory_space<smem>>
    %c14 = arith.constant 14 : index
    %14 = memref.load %arg4[%c14] : memref<153xf32, #tpu.memory_space<smem>>
    %c15 = arith.constant 15 : index
    %15 = memref.load %arg4[%c15] : memref<153xf32, #tpu.memory_space<smem>>
    %c16 = arith.constant 16 : index
    %16 = memref.load %arg4[%c16] : memref<153xf32, #tpu.memory_space<smem>>
    %c17 = arith.constant 17 : index
    %17 = memref.load %arg4[%c17] : memref<153xf32, #tpu.memory_space<smem>>
    %c18 = arith.constant 18 : index
    %18 = memref.load %arg4[%c18] : memref<153xf32, #tpu.memory_space<smem>>
    %c19 = arith.constant 19 : index
    %19 = memref.load %arg4[%c19] : memref<153xf32, #tpu.memory_space<smem>>
    %c20 = arith.constant 20 : index
    %20 = memref.load %arg4[%c20] : memref<153xf32, #tpu.memory_space<smem>>
    %c21 = arith.constant 21 : index
    %21 = memref.load %arg4[%c21] : memref<153xf32, #tpu.memory_space<smem>>
    %c22 = arith.constant 22 : index
    %22 = memref.load %arg4[%c22] : memref<153xf32, #tpu.memory_space<smem>>
    %c23 = arith.constant 23 : index
    %23 = memref.load %arg4[%c23] : memref<153xf32, #tpu.memory_space<smem>>
    %c24 = arith.constant 24 : index
    %24 = memref.load %arg4[%c24] : memref<153xf32, #tpu.memory_space<smem>>
    %c25 = arith.constant 25 : index
    %25 = memref.load %arg4[%c25] : memref<153xf32, #tpu.memory_space<smem>>
    %c26 = arith.constant 26 : index
    %26 = memref.load %arg4[%c26] : memref<153xf32, #tpu.memory_space<smem>>
    %c27 = arith.constant 27 : index
    %27 = memref.load %arg4[%c27] : memref<153xf32, #tpu.memory_space<smem>>
    %c28 = arith.constant 28 : index
    %28 = memref.load %arg4[%c28] : memref<153xf32, #tpu.memory_space<smem>>
    %c29 = arith.constant 29 : index
    %29 = memref.load %arg4[%c29] : memref<153xf32, #tpu.memory_space<smem>>
    %c30 = arith.constant 30 : index
    %30 = memref.load %arg4[%c30] : memref<153xf32, #tpu.memory_space<smem>>
    %c31 = arith.constant 31 : index
    %31 = memref.load %arg4[%c31] : memref<153xf32, #tpu.memory_space<smem>>
    %c32 = arith.constant 32 : index
    %32 = memref.load %arg4[%c32] : memref<153xf32, #tpu.memory_space<smem>>
    %c33 = arith.constant 33 : index
    %33 = memref.load %arg4[%c33] : memref<153xf32, #tpu.memory_space<smem>>
    %c34 = arith.constant 34 : index
    %34 = memref.load %arg4[%c34] : memref<153xf32, #tpu.memory_space<smem>>
    %c35 = arith.constant 35 : index
    %35 = memref.load %arg4[%c35] : memref<153xf32, #tpu.memory_space<smem>>
    %c36 = arith.constant 36 : index
    %36 = memref.load %arg4[%c36] : memref<153xf32, #tpu.memory_space<smem>>
    %c37 = arith.constant 37 : index
    %37 = memref.load %arg4[%c37] : memref<153xf32, #tpu.memory_space<smem>>
    %c38 = arith.constant 38 : index
    %38 = memref.load %arg4[%c38] : memref<153xf32, #tpu.memory_space<smem>>
    %c39 = arith.constant 39 : index
    %39 = memref.load %arg4[%c39] : memref<153xf32, #tpu.memory_space<smem>>
    %c40 = arith.constant 40 : index
    %40 = memref.load %arg4[%c40] : memref<153xf32, #tpu.memory_space<smem>>
    %c41 = arith.constant 41 : index
    %41 = memref.load %arg4[%c41] : memref<153xf32, #tpu.memory_space<smem>>
    %c42 = arith.constant 42 : index
    %42 = memref.load %arg4[%c42] : memref<153xf32, #tpu.memory_space<smem>>
    %c43 = arith.constant 43 : index
    %43 = memref.load %arg4[%c43] : memref<153xf32, #tpu.memory_space<smem>>
    %c44 = arith.constant 44 : index
    %44 = memref.load %arg4[%c44] : memref<153xf32, #tpu.memory_space<smem>>
    %c45 = arith.constant 45 : index
    %45 = memref.load %arg4[%c45] : memref<153xf32, #tpu.memory_space<smem>>
    %c46 = arith.constant 46 : index
    %46 = memref.load %arg4[%c46] : memref<153xf32, #tpu.memory_space<smem>>
    %c47 = arith.constant 47 : index
    %47 = memref.load %arg4[%c47] : memref<153xf32, #tpu.memory_space<smem>>
    %c48 = arith.constant 48 : index
    %48 = memref.load %arg4[%c48] : memref<153xf32, #tpu.memory_space<smem>>
    %c49 = arith.constant 49 : index
    %49 = memref.load %arg4[%c49] : memref<153xf32, #tpu.memory_space<smem>>
    %c50 = arith.constant 50 : index
    %50 = memref.load %arg4[%c50] : memref<153xf32, #tpu.memory_space<smem>>
    %c51 = arith.constant 51 : index
    %51 = memref.load %arg4[%c51] : memref<153xf32, #tpu.memory_space<smem>>
    %c52 = arith.constant 52 : index
    %52 = memref.load %arg4[%c52] : memref<153xf32, #tpu.memory_space<smem>>
    %c53 = arith.constant 53 : index
    %53 = memref.load %arg4[%c53] : memref<153xf32, #tpu.memory_space<smem>>
    %c54 = arith.constant 54 : index
    %54 = memref.load %arg4[%c54] : memref<153xf32, #tpu.memory_space<smem>>
    %c55 = arith.constant 55 : index
    %55 = memref.load %arg4[%c55] : memref<153xf32, #tpu.memory_space<smem>>
    %c56 = arith.constant 56 : index
    %56 = memref.load %arg4[%c56] : memref<153xf32, #tpu.memory_space<smem>>
    %c57 = arith.constant 57 : index
    %57 = memref.load %arg4[%c57] : memref<153xf32, #tpu.memory_space<smem>>
    %c58 = arith.constant 58 : index
    %58 = memref.load %arg4[%c58] : memref<153xf32, #tpu.memory_space<smem>>
    %c59 = arith.constant 59 : index
    %59 = memref.load %arg4[%c59] : memref<153xf32, #tpu.memory_space<smem>>
    %c60 = arith.constant 60 : index
    %60 = memref.load %arg4[%c60] : memref<153xf32, #tpu.memory_space<smem>>
    %c61 = arith.constant 61 : index
    %61 = memref.load %arg4[%c61] : memref<153xf32, #tpu.memory_space<smem>>
    %c62 = arith.constant 62 : index
    %62 = memref.load %arg4[%c62] : memref<153xf32, #tpu.memory_space<smem>>
    %c63 = arith.constant 63 : index
    %63 = memref.load %arg4[%c63] : memref<153xf32, #tpu.memory_space<smem>>
    %c64 = arith.constant 64 : index
    %64 = memref.load %arg4[%c64] : memref<153xf32, #tpu.memory_space<smem>>
    %c65 = arith.constant 65 : index
    %65 = memref.load %arg4[%c65] : memref<153xf32, #tpu.memory_space<smem>>
    %c66 = arith.constant 66 : index
    %66 = memref.load %arg4[%c66] : memref<153xf32, #tpu.memory_space<smem>>
    %c67 = arith.constant 67 : index
    %67 = memref.load %arg4[%c67] : memref<153xf32, #tpu.memory_space<smem>>
    %c68 = arith.constant 68 : index
    %68 = memref.load %arg4[%c68] : memref<153xf32, #tpu.memory_space<smem>>
    %c69 = arith.constant 69 : index
    %69 = memref.load %arg4[%c69] : memref<153xf32, #tpu.memory_space<smem>>
    %c70 = arith.constant 70 : index
    %70 = memref.load %arg4[%c70] : memref<153xf32, #tpu.memory_space<smem>>
    %c71 = arith.constant 71 : index
    %71 = memref.load %arg4[%c71] : memref<153xf32, #tpu.memory_space<smem>>
    %c72 = arith.constant 72 : index
    %72 = memref.load %arg4[%c72] : memref<153xf32, #tpu.memory_space<smem>>
    %c73 = arith.constant 73 : index
    %73 = memref.load %arg4[%c73] : memref<153xf32, #tpu.memory_space<smem>>
    %c74 = arith.constant 74 : index
    %74 = memref.load %arg4[%c74] : memref<153xf32, #tpu.memory_space<smem>>
    %c75 = arith.constant 75 : index
    %75 = memref.load %arg4[%c75] : memref<153xf32, #tpu.memory_space<smem>>
    %c76 = arith.constant 76 : index
    %76 = memref.load %arg4[%c76] : memref<153xf32, #tpu.memory_space<smem>>
    %c77 = arith.constant 77 : index
    %77 = memref.load %arg4[%c77] : memref<153xf32, #tpu.memory_space<smem>>
    %c78 = arith.constant 78 : index
    %78 = memref.load %arg4[%c78] : memref<153xf32, #tpu.memory_space<smem>>
    %c79 = arith.constant 79 : index
    %79 = memref.load %arg4[%c79] : memref<153xf32, #tpu.memory_space<smem>>
    %c80 = arith.constant 80 : index
    %80 = memref.load %arg4[%c80] : memref<153xf32, #tpu.memory_space<smem>>
    %c81 = arith.constant 81 : index
    %81 = memref.load %arg4[%c81] : memref<153xf32, #tpu.memory_space<smem>>
    %c82 = arith.constant 82 : index
    %82 = memref.load %arg4[%c82] : memref<153xf32, #tpu.memory_space<smem>>
    %c83 = arith.constant 83 : index
    %83 = memref.load %arg4[%c83] : memref<153xf32, #tpu.memory_space<smem>>
    %c84 = arith.constant 84 : index
    %84 = memref.load %arg4[%c84] : memref<153xf32, #tpu.memory_space<smem>>
    %c85 = arith.constant 85 : index
    %85 = memref.load %arg4[%c85] : memref<153xf32, #tpu.memory_space<smem>>
    %c86 = arith.constant 86 : index
    %86 = memref.load %arg4[%c86] : memref<153xf32, #tpu.memory_space<smem>>
    %c87 = arith.constant 87 : index
    %87 = memref.load %arg4[%c87] : memref<153xf32, #tpu.memory_space<smem>>
    %c88 = arith.constant 88 : index
    %88 = memref.load %arg4[%c88] : memref<153xf32, #tpu.memory_space<smem>>
    %c89 = arith.constant 89 : index
    %89 = memref.load %arg4[%c89] : memref<153xf32, #tpu.memory_space<smem>>
    %c90 = arith.constant 90 : index
    %90 = memref.load %arg4[%c90] : memref<153xf32, #tpu.memory_space<smem>>
    %c91 = arith.constant 91 : index
    %91 = memref.load %arg4[%c91] : memref<153xf32, #tpu.memory_space<smem>>
    %c92 = arith.constant 92 : index
    %92 = memref.load %arg4[%c92] : memref<153xf32, #tpu.memory_space<smem>>
    %c93 = arith.constant 93 : index
    %93 = memref.load %arg4[%c93] : memref<153xf32, #tpu.memory_space<smem>>
    %c94 = arith.constant 94 : index
    %94 = memref.load %arg4[%c94] : memref<153xf32, #tpu.memory_space<smem>>
    %c95 = arith.constant 95 : index
    %95 = memref.load %arg4[%c95] : memref<153xf32, #tpu.memory_space<smem>>
    %c96 = arith.constant 96 : index
    %96 = memref.load %arg4[%c96] : memref<153xf32, #tpu.memory_space<smem>>
    %c97 = arith.constant 97 : index
    %97 = memref.load %arg4[%c97] : memref<153xf32, #tpu.memory_space<smem>>
    %c98 = arith.constant 98 : index
    %98 = memref.load %arg4[%c98] : memref<153xf32, #tpu.memory_space<smem>>
    %c99 = arith.constant 99 : index
    %99 = memref.load %arg4[%c99] : memref<153xf32, #tpu.memory_space<smem>>
    %c100 = arith.constant 100 : index
    %100 = memref.load %arg4[%c100] : memref<153xf32, #tpu.memory_space<smem>>
    %c101 = arith.constant 101 : index
    %101 = memref.load %arg4[%c101] : memref<153xf32, #tpu.memory_space<smem>>
    %c102 = arith.constant 102 : index
    %102 = memref.load %arg4[%c102] : memref<153xf32, #tpu.memory_space<smem>>
    %c103 = arith.constant 103 : index
    %103 = memref.load %arg4[%c103] : memref<153xf32, #tpu.memory_space<smem>>
    %c104 = arith.constant 104 : index
    %104 = memref.load %arg4[%c104] : memref<153xf32, #tpu.memory_space<smem>>
    %c105 = arith.constant 105 : index
    %105 = memref.load %arg4[%c105] : memref<153xf32, #tpu.memory_space<smem>>
    %c106 = arith.constant 106 : index
    %106 = memref.load %arg4[%c106] : memref<153xf32, #tpu.memory_space<smem>>
    %c107 = arith.constant 107 : index
    %107 = memref.load %arg4[%c107] : memref<153xf32, #tpu.memory_space<smem>>
    %c108 = arith.constant 108 : index
    %108 = memref.load %arg4[%c108] : memref<153xf32, #tpu.memory_space<smem>>
    %c109 = arith.constant 109 : index
    %109 = memref.load %arg4[%c109] : memref<153xf32, #tpu.memory_space<smem>>
    %c110 = arith.constant 110 : index
    %110 = memref.load %arg4[%c110] : memref<153xf32, #tpu.memory_space<smem>>
    %c111 = arith.constant 111 : index
    %111 = memref.load %arg4[%c111] : memref<153xf32, #tpu.memory_space<smem>>
    %c112 = arith.constant 112 : index
    %112 = memref.load %arg4[%c112] : memref<153xf32, #tpu.memory_space<smem>>
    %c113 = arith.constant 113 : index
    %113 = memref.load %arg4[%c113] : memref<153xf32, #tpu.memory_space<smem>>
    %c114 = arith.constant 114 : index
    %114 = memref.load %arg4[%c114] : memref<153xf32, #tpu.memory_space<smem>>
    %c115 = arith.constant 115 : index
    %115 = memref.load %arg4[%c115] : memref<153xf32, #tpu.memory_space<smem>>
    %c116 = arith.constant 116 : index
    %116 = memref.load %arg4[%c116] : memref<153xf32, #tpu.memory_space<smem>>
    %c117 = arith.constant 117 : index
    %117 = memref.load %arg4[%c117] : memref<153xf32, #tpu.memory_space<smem>>
    %c118 = arith.constant 118 : index
    %118 = memref.load %arg4[%c118] : memref<153xf32, #tpu.memory_space<smem>>
    %c119 = arith.constant 119 : index
    %119 = memref.load %arg4[%c119] : memref<153xf32, #tpu.memory_space<smem>>
    %c120 = arith.constant 120 : index
    %120 = memref.load %arg4[%c120] : memref<153xf32, #tpu.memory_space<smem>>
    %c121 = arith.constant 121 : index
    %121 = memref.load %arg4[%c121] : memref<153xf32, #tpu.memory_space<smem>>
    %c122 = arith.constant 122 : index
    %122 = memref.load %arg4[%c122] : memref<153xf32, #tpu.memory_space<smem>>
    %c123 = arith.constant 123 : index
    %123 = memref.load %arg4[%c123] : memref<153xf32, #tpu.memory_space<smem>>
    %c124 = arith.constant 124 : index
    %124 = memref.load %arg4[%c124] : memref<153xf32, #tpu.memory_space<smem>>
    %c125 = arith.constant 125 : index
    %125 = memref.load %arg4[%c125] : memref<153xf32, #tpu.memory_space<smem>>
    %c126 = arith.constant 126 : index
    %126 = memref.load %arg4[%c126] : memref<153xf32, #tpu.memory_space<smem>>
    %c127 = arith.constant 127 : index
    %127 = memref.load %arg4[%c127] : memref<153xf32, #tpu.memory_space<smem>>
    %c128 = arith.constant 128 : index
    %128 = memref.load %arg4[%c128] : memref<153xf32, #tpu.memory_space<smem>>
    %c129 = arith.constant 129 : index
    %129 = memref.load %arg4[%c129] : memref<153xf32, #tpu.memory_space<smem>>
    %c130 = arith.constant 130 : index
    %130 = memref.load %arg4[%c130] : memref<153xf32, #tpu.memory_space<smem>>
    %c131 = arith.constant 131 : index
    %131 = memref.load %arg4[%c131] : memref<153xf32, #tpu.memory_space<smem>>
    %c132 = arith.constant 132 : index
    %132 = memref.load %arg4[%c132] : memref<153xf32, #tpu.memory_space<smem>>
    %c133 = arith.constant 133 : index
    %133 = memref.load %arg4[%c133] : memref<153xf32, #tpu.memory_space<smem>>
    %c134 = arith.constant 134 : index
    %134 = memref.load %arg4[%c134] : memref<153xf32, #tpu.memory_space<smem>>
    %c135 = arith.constant 135 : index
    %135 = memref.load %arg4[%c135] : memref<153xf32, #tpu.memory_space<smem>>
    %c136 = arith.constant 136 : index
    %136 = memref.load %arg4[%c136] : memref<153xf32, #tpu.memory_space<smem>>
    %c137 = arith.constant 137 : index
    %137 = memref.load %arg4[%c137] : memref<153xf32, #tpu.memory_space<smem>>
    %c138 = arith.constant 138 : index
    %138 = memref.load %arg4[%c138] : memref<153xf32, #tpu.memory_space<smem>>
    %c139 = arith.constant 139 : index
    %139 = memref.load %arg4[%c139] : memref<153xf32, #tpu.memory_space<smem>>
    %c140 = arith.constant 140 : index
    %140 = memref.load %arg4[%c140] : memref<153xf32, #tpu.memory_space<smem>>
    %c141 = arith.constant 141 : index
    %141 = memref.load %arg4[%c141] : memref<153xf32, #tpu.memory_space<smem>>
    %c142 = arith.constant 142 : index
    %142 = memref.load %arg4[%c142] : memref<153xf32, #tpu.memory_space<smem>>
    %c143 = arith.constant 143 : index
    %143 = memref.load %arg4[%c143] : memref<153xf32, #tpu.memory_space<smem>>
    %c144 = arith.constant 144 : index
    %144 = memref.load %arg4[%c144] : memref<153xf32, #tpu.memory_space<smem>>
    %c145 = arith.constant 145 : index
    %145 = memref.load %arg4[%c145] : memref<153xf32, #tpu.memory_space<smem>>
    %c146 = arith.constant 146 : index
    %146 = memref.load %arg4[%c146] : memref<153xf32, #tpu.memory_space<smem>>
    %c147 = arith.constant 147 : index
    %147 = memref.load %arg4[%c147] : memref<153xf32, #tpu.memory_space<smem>>
    %c148 = arith.constant 148 : index
    %148 = memref.load %arg4[%c148] : memref<153xf32, #tpu.memory_space<smem>>
    %c149 = arith.constant 149 : index
    %149 = memref.load %arg4[%c149] : memref<153xf32, #tpu.memory_space<smem>>
    %c150 = arith.constant 150 : index
    %150 = memref.load %arg4[%c150] : memref<153xf32, #tpu.memory_space<smem>>
    %c151 = arith.constant 151 : index
    %151 = memref.load %arg4[%c151] : memref<153xf32, #tpu.memory_space<smem>>
    %c152 = arith.constant 152 : index
    %152 = memref.load %arg4[%c152] : memref<153xf32, #tpu.memory_space<smem>>
    %c0_i32 = arith.constant 0 : i32
    %153 = arith.cmpi eq, %arg1, %c0_i32 : i32
    %154 = arith.extui %153 : i1 to i32
    %c0_i32_0 = arith.constant 0 : i32
    %155 = arith.cmpi ne, %154, %c0_i32_0 : i32
    scf.if %155 {
      %cst_33 = arith.constant 0.000000e+00 : f32
      %646 = vector.broadcast %cst_33 : f32 to vector<2x128xf32>
      %c0_34 = arith.constant 0 : index
      %c0_35 = arith.constant 0 : index
      %c0_36 = arith.constant 0 : index
      %647 = vector.load %arg6[%c0_34, %c0_35, %c0_36] : memref<1x2x144xf32, #tpu.memory_space<vmem>>, vector<1x2x128xf32>
      %648 = vector.shape_cast %647 : vector<1x2x128xf32> to vector<2x128xf32>
      %649 = vector.shape_cast %646 : vector<2x128xf32> to vector<1x2x128xf32>
      tpu.vector_store %arg6[%c0_34, %c0_35, %c0_36], %649 {strides = array<i32>} : memref<1x2x144xf32, #tpu.memory_space<vmem>>, vector<1x2x128xf32>,
    } else {
    }
    %c0_i32_1 = arith.constant 0 : i32
    %156 = arith.cmpi sgt, %arg1, %c0_i32_1 : i32
    %157 = arith.extui %156 : i1 to i32
    %c0_i32_2 = arith.constant 0 : i32
    %158 = arith.cmpi ne, %157, %c0_i32_2 : i32
    scf.if %158 {
      %c0_33 = arith.constant 0 : index
      %c0_34 = arith.constant 0 : index
      %646 = vector.load %arg3[%c0_33, %c0_34] : memref<2x16xf32, #tpu.memory_space<vmem>>, vector<2x16xf32>
      %c0_35 = arith.constant 0 : index
      %c0_36 = arith.constant 0 : index
      %c112_37 = arith.constant 112 : index
      %647 = vector.load %arg6[%c0_35, %c0_36, %c112_37] : memref<1x2x144xf32, #tpu.memory_space<vmem>>, vector<1x2x16xf32>
      %648 = vector.shape_cast %647 : vector<1x2x16xf32> to vector<2x16xf32>
      %649 = vector.shape_cast %646 : vector<2x16xf32> to vector<1x2x16xf32>
      tpu.vector_store %arg6[%c0_35, %c0_36, %c112_37], %649 {strides = array<i32>} : memref<1x2x144xf32, #tpu.memory_space<vmem>>, vector<1x2x16xf32>,
    } else {
    }
    %c0_3 = arith.constant 0 : index
    %c0_4 = arith.constant 0 : index
    %159 = vector.load %arg2[%c0_3, %c0_4] : memref<2x16xf32, #tpu.memory_space<vmem>>, vector<2x16xf32>
    %c0_5 = arith.constant 0 : index
    %c0_6 = arith.constant 0 : index
    %c128_7 = arith.constant 128 : index
    %160 = vector.load %arg6[%c0_5, %c0_6, %c128_7] : memref<1x2x144xf32, #tpu.memory_space<vmem>>, vector<1x2x16xf32>
    %161 = vector.shape_cast %160 : vector<1x2x16xf32> to vector<2x16xf32>
    %162 = vector.shape_cast %159 : vector<2x16xf32> to vector<1x2x16xf32>
    tpu.vector_store %arg6[%c0_5, %c0_6, %c128_7], %162 {strides = array<i32>} : memref<1x2x144xf32, #tpu.memory_space<vmem>>, vector<1x2x16xf32>,
    %c0_i32_8 = arith.constant 0 : i32
    %163 = arith.index_cast %c0_i32_8 : i32 to index
    %c0_9 = arith.constant 0 : index
    %c0_10 = arith.constant 0 : index
    %164 = vector.load %arg6[%163, %c0_9, %c0_10] : memref<1x2x144xf32, #tpu.memory_space<vmem>>, vector<1x2x144xf32>
    %165 = vector.shape_cast %164 : vector<1x2x144xf32> to vector<2x144xf32>
    %166 = vector.broadcast %64 : f32 to vector<2x16xf32>
    %167 = vector.broadcast %65 : f32 to vector<2x16xf32>
    %168 = vector.broadcast %66 : f32 to vector<2x16xf32>
    %169 = vector.broadcast %67 : f32 to vector<2x16xf32>
    %170 = vector.broadcast %68 : f32 to vector<2x16xf32>
    %171 = vector.broadcast %69 : f32 to vector<2x16xf32>
    %172 = vector.broadcast %70 : f32 to vector<2x16xf32>
    %173 = vector.broadcast %71 : f32 to vector<2x16xf32>
    %174 = vector.extract_strided_slice %165 {offsets = [0, 120], sizes = [2, 16], strides = [1, 1]} : vector<2x144xf32> to vector<2x16xf32>
    %175 = vector.broadcast %0 : f32 to vector<2x16xf32>
    %176 = arith.mulf %174, %175 : vector<2x16xf32>
    %177 = arith.addf %166, %176 : vector<2x16xf32>
    %178 = vector.broadcast %8 : f32 to vector<2x16xf32>
    %179 = arith.mulf %174, %178 : vector<2x16xf32>
    %180 = arith.addf %167, %179 : vector<2x16xf32>
    %181 = vector.broadcast %16 : f32 to vector<2x16xf32>
    %182 = arith.mulf %174, %181 : vector<2x16xf32>
    %183 = arith.addf %168, %182 : vector<2x16xf32>
    %184 = vector.broadcast %24 : f32 to vector<2x16xf32>
    %185 = arith.mulf %174, %184 : vector<2x16xf32>
    %186 = arith.addf %169, %185 : vector<2x16xf32>
    %187 = vector.broadcast %32 : f32 to vector<2x16xf32>
    %188 = arith.mulf %174, %187 : vector<2x16xf32>
    %189 = arith.addf %170, %188 : vector<2x16xf32>
    %190 = vector.broadcast %40 : f32 to vector<2x16xf32>
    %191 = arith.mulf %174, %190 : vector<2x16xf32>
    %192 = arith.addf %171, %191 : vector<2x16xf32>
    %193 = vector.broadcast %48 : f32 to vector<2x16xf32>
    %194 = arith.mulf %174, %193 : vector<2x16xf32>
    %195 = arith.addf %172, %194 : vector<2x16xf32>
    %196 = vector.broadcast %56 : f32 to vector<2x16xf32>
    %197 = arith.mulf %174, %196 : vector<2x16xf32>
    %198 = arith.addf %173, %197 : vector<2x16xf32>
    %199 = vector.extract_strided_slice %165 {offsets = [0, 121], sizes = [2, 16], strides = [1, 1]} : vector<2x144xf32> to vector<2x16xf32>
    %200 = vector.broadcast %1 : f32 to vector<2x16xf32>
    %201 = arith.mulf %199, %200 : vector<2x16xf32>
    %202 = arith.addf %177, %201 : vector<2x16xf32>
    %203 = vector.broadcast %9 : f32 to vector<2x16xf32>
    %204 = arith.mulf %199, %203 : vector<2x16xf32>
    %205 = arith.addf %180, %204 : vector<2x16xf32>
    %206 = vector.broadcast %17 : f32 to vector<2x16xf32>
    %207 = arith.mulf %199, %206 : vector<2x16xf32>
    %208 = arith.addf %183, %207 : vector<2x16xf32>
    %209 = vector.broadcast %25 : f32 to vector<2x16xf32>
    %210 = arith.mulf %199, %209 : vector<2x16xf32>
    %211 = arith.addf %186, %210 : vector<2x16xf32>
    %212 = vector.broadcast %33 : f32 to vector<2x16xf32>
    %213 = arith.mulf %199, %212 : vector<2x16xf32>
    %214 = arith.addf %189, %213 : vector<2x16xf32>
    %215 = vector.broadcast %41 : f32 to vector<2x16xf32>
    %216 = arith.mulf %199, %215 : vector<2x16xf32>
    %217 = arith.addf %192, %216 : vector<2x16xf32>
    %218 = vector.broadcast %49 : f32 to vector<2x16xf32>
    %219 = arith.mulf %199, %218 : vector<2x16xf32>
    %220 = arith.addf %195, %219 : vector<2x16xf32>
    %221 = vector.broadcast %57 : f32 to vector<2x16xf32>
    %222 = arith.mulf %199, %221 : vector<2x16xf32>
    %223 = arith.addf %198, %222 : vector<2x16xf32>
    %224 = vector.extract_strided_slice %165 {offsets = [0, 122], sizes = [2, 16], strides = [1, 1]} : vector<2x144xf32> to vector<2x16xf32>
    %225 = vector.broadcast %2 : f32 to vector<2x16xf32>
    %226 = arith.mulf %224, %225 : vector<2x16xf32>
    %227 = arith.addf %202, %226 : vector<2x16xf32>
    %228 = vector.broadcast %10 : f32 to vector<2x16xf32>
    %229 = arith.mulf %224, %228 : vector<2x16xf32>
    %230 = arith.addf %205, %229 : vector<2x16xf32>
    %231 = vector.broadcast %18 : f32 to vector<2x16xf32>
    %232 = arith.mulf %224, %231 : vector<2x16xf32>
    %233 = arith.addf %208, %232 : vector<2x16xf32>
    %234 = vector.broadcast %26 : f32 to vector<2x16xf32>
    %235 = arith.mulf %224, %234 : vector<2x16xf32>
    %236 = arith.addf %211, %235 : vector<2x16xf32>
    %237 = vector.broadcast %34 : f32 to vector<2x16xf32>
    %238 = arith.mulf %224, %237 : vector<2x16xf32>
    %239 = arith.addf %214, %238 : vector<2x16xf32>
    %240 = vector.broadcast %42 : f32 to vector<2x16xf32>
    %241 = arith.mulf %224, %240 : vector<2x16xf32>
    %242 = arith.addf %217, %241 : vector<2x16xf32>
    %243 = vector.broadcast %50 : f32 to vector<2x16xf32>
    %244 = arith.mulf %224, %243 : vector<2x16xf32>
    %245 = arith.addf %220, %244 : vector<2x16xf32>
    %246 = vector.broadcast %58 : f32 to vector<2x16xf32>
    %247 = arith.mulf %224, %246 : vector<2x16xf32>
    %248 = arith.addf %223, %247 : vector<2x16xf32>
    %249 = vector.extract_strided_slice %165 {offsets = [0, 123], sizes = [2, 16], strides = [1, 1]} : vector<2x144xf32> to vector<2x16xf32>
    %250 = vector.broadcast %3 : f32 to vector<2x16xf32>
    %251 = arith.mulf %249, %250 : vector<2x16xf32>
    %252 = arith.addf %227, %251 : vector<2x16xf32>
    %253 = vector.broadcast %11 : f32 to vector<2x16xf32>
    %254 = arith.mulf %249, %253 : vector<2x16xf32>
    %255 = arith.addf %230, %254 : vector<2x16xf32>
    %256 = vector.broadcast %19 : f32 to vector<2x16xf32>
    %257 = arith.mulf %249, %256 : vector<2x16xf32>
    %258 = arith.addf %233, %257 : vector<2x16xf32>
    %259 = vector.broadcast %27 : f32 to vector<2x16xf32>
    %260 = arith.mulf %249, %259 : vector<2x16xf32>
    %261 = arith.addf %236, %260 : vector<2x16xf32>
    %262 = vector.broadcast %35 : f32 to vector<2x16xf32>
    %263 = arith.mulf %249, %262 : vector<2x16xf32>
    %264 = arith.addf %239, %263 : vector<2x16xf32>
    %265 = vector.broadcast %43 : f32 to vector<2x16xf32>
    %266 = arith.mulf %249, %265 : vector<2x16xf32>
    %267 = arith.addf %242, %266 : vector<2x16xf32>
    %268 = vector.broadcast %51 : f32 to vector<2x16xf32>
    %269 = arith.mulf %249, %268 : vector<2x16xf32>
    %270 = arith.addf %245, %269 : vector<2x16xf32>
    %271 = vector.broadcast %59 : f32 to vector<2x16xf32>
    %272 = arith.mulf %249, %271 : vector<2x16xf32>
    %273 = arith.addf %248, %272 : vector<2x16xf32>
    %274 = vector.extract_strided_slice %165 {offsets = [0, 124], sizes = [2, 16], strides = [1, 1]} : vector<2x144xf32> to vector<2x16xf32>
    %275 = vector.broadcast %4 : f32 to vector<2x16xf32>
    %276 = arith.mulf %274, %275 : vector<2x16xf32>
    %277 = arith.addf %252, %276 : vector<2x16xf32>
    %278 = vector.broadcast %12 : f32 to vector<2x16xf32>
    %279 = arith.mulf %274, %278 : vector<2x16xf32>
    %280 = arith.addf %255, %279 : vector<2x16xf32>
    %281 = vector.broadcast %20 : f32 to vector<2x16xf32>
    %282 = arith.mulf %274, %281 : vector<2x16xf32>
    %283 = arith.addf %258, %282 : vector<2x16xf32>
    %284 = vector.broadcast %28 : f32 to vector<2x16xf32>
    %285 = arith.mulf %274, %284 : vector<2x16xf32>
    %286 = arith.addf %261, %285 : vector<2x16xf32>
    %287 = vector.broadcast %36 : f32 to vector<2x16xf32>
    %288 = arith.mulf %274, %287 : vector<2x16xf32>
    %289 = arith.addf %264, %288 : vector<2x16xf32>
    %290 = vector.broadcast %44 : f32 to vector<2x16xf32>
    %291 = arith.mulf %274, %290 : vector<2x16xf32>
    %292 = arith.addf %267, %291 : vector<2x16xf32>
    %293 = vector.broadcast %52 : f32 to vector<2x16xf32>
    %294 = arith.mulf %274, %293 : vector<2x16xf32>
    %295 = arith.addf %270, %294 : vector<2x16xf32>
    %296 = vector.broadcast %60 : f32 to vector<2x16xf32>
    %297 = arith.mulf %274, %296 : vector<2x16xf32>
    %298 = arith.addf %273, %297 : vector<2x16xf32>
    %299 = vector.extract_strided_slice %165 {offsets = [0, 125], sizes = [2, 16], strides = [1, 1]} : vector<2x144xf32> to vector<2x16xf32>
    %300 = vector.broadcast %5 : f32 to vector<2x16xf32>
    %301 = arith.mulf %299, %300 : vector<2x16xf32>
    %302 = arith.addf %277, %301 : vector<2x16xf32>
    %303 = vector.broadcast %13 : f32 to vector<2x16xf32>
    %304 = arith.mulf %299, %303 : vector<2x16xf32>
    %305 = arith.addf %280, %304 : vector<2x16xf32>
    %306 = vector.broadcast %21 : f32 to vector<2x16xf32>
    %307 = arith.mulf %299, %306 : vector<2x16xf32>
    %308 = arith.addf %283, %307 : vector<2x16xf32>
    %309 = vector.broadcast %29 : f32 to vector<2x16xf32>
    %310 = arith.mulf %299, %309 : vector<2x16xf32>
    %311 = arith.addf %286, %310 : vector<2x16xf32>
    %312 = vector.broadcast %37 : f32 to vector<2x16xf32>
    %313 = arith.mulf %299, %312 : vector<2x16xf32>
    %314 = arith.addf %289, %313 : vector<2x16xf32>
    %315 = vector.broadcast %45 : f32 to vector<2x16xf32>
    %316 = arith.mulf %299, %315 : vector<2x16xf32>
    %317 = arith.addf %292, %316 : vector<2x16xf32>
    %318 = vector.broadcast %53 : f32 to vector<2x16xf32>
    %319 = arith.mulf %299, %318 : vector<2x16xf32>
    %320 = arith.addf %295, %319 : vector<2x16xf32>
    %321 = vector.broadcast %61 : f32 to vector<2x16xf32>
    %322 = arith.mulf %299, %321 : vector<2x16xf32>
    %323 = arith.addf %298, %322 : vector<2x16xf32>
    %324 = vector.extract_strided_slice %165 {offsets = [0, 126], sizes = [2, 16], strides = [1, 1]} : vector<2x144xf32> to vector<2x16xf32>
    %325 = vector.broadcast %6 : f32 to vector<2x16xf32>
    %326 = arith.mulf %324, %325 : vector<2x16xf32>
    %327 = arith.addf %302, %326 : vector<2x16xf32>
    %328 = vector.broadcast %14 : f32 to vector<2x16xf32>
    %329 = arith.mulf %324, %328 : vector<2x16xf32>
    %330 = arith.addf %305, %329 : vector<2x16xf32>
    %331 = vector.broadcast %22 : f32 to vector<2x16xf32>
    %332 = arith.mulf %324, %331 : vector<2x16xf32>
    %333 = arith.addf %308, %332 : vector<2x16xf32>
    %334 = vector.broadcast %30 : f32 to vector<2x16xf32>
    %335 = arith.mulf %324, %334 : vector<2x16xf32>
    %336 = arith.addf %311, %335 : vector<2x16xf32>
    %337 = vector.broadcast %38 : f32 to vector<2x16xf32>
    %338 = arith.mulf %324, %337 : vector<2x16xf32>
    %339 = arith.addf %314, %338 : vector<2x16xf32>
    %340 = vector.broadcast %46 : f32 to vector<2x16xf32>
    %341 = arith.mulf %324, %340 : vector<2x16xf32>
    %342 = arith.addf %317, %341 : vector<2x16xf32>
    %343 = vector.broadcast %54 : f32 to vector<2x16xf32>
    %344 = arith.mulf %324, %343 : vector<2x16xf32>
    %345 = arith.addf %320, %344 : vector<2x16xf32>
    %346 = vector.broadcast %62 : f32 to vector<2x16xf32>
    %347 = arith.mulf %324, %346 : vector<2x16xf32>
    %348 = arith.addf %323, %347 : vector<2x16xf32>
    %349 = vector.extract_strided_slice %165 {offsets = [0, 127], sizes = [2, 16], strides = [1, 1]} : vector<2x144xf32> to vector<2x16xf32>
    %350 = vector.broadcast %7 : f32 to vector<2x16xf32>
    %351 = arith.mulf %349, %350 : vector<2x16xf32>
    %352 = arith.addf %327, %351 : vector<2x16xf32>
    %353 = vector.broadcast %15 : f32 to vector<2x16xf32>
    %354 = arith.mulf %349, %353 : vector<2x16xf32>
    %355 = arith.addf %330, %354 : vector<2x16xf32>
    %356 = vector.broadcast %23 : f32 to vector<2x16xf32>
    %357 = arith.mulf %349, %356 : vector<2x16xf32>
    %358 = arith.addf %333, %357 : vector<2x16xf32>
    %359 = vector.broadcast %31 : f32 to vector<2x16xf32>
    %360 = arith.mulf %349, %359 : vector<2x16xf32>
    %361 = arith.addf %336, %360 : vector<2x16xf32>
    %362 = vector.broadcast %39 : f32 to vector<2x16xf32>
    %363 = arith.mulf %349, %362 : vector<2x16xf32>
    %364 = arith.addf %339, %363 : vector<2x16xf32>
    %365 = vector.broadcast %47 : f32 to vector<2x16xf32>
    %366 = arith.mulf %349, %365 : vector<2x16xf32>
    %367 = arith.addf %342, %366 : vector<2x16xf32>
    %368 = vector.broadcast %55 : f32 to vector<2x16xf32>
    %369 = arith.mulf %349, %368 : vector<2x16xf32>
    %370 = arith.addf %345, %369 : vector<2x16xf32>
    %371 = vector.broadcast %63 : f32 to vector<2x16xf32>
    %372 = arith.mulf %349, %371 : vector<2x16xf32>
    %373 = arith.addf %348, %372 : vector<2x16xf32>
    %cst = arith.constant 0.000000e+00 : f32
    %374 = vector.broadcast %cst : f32 to vector<2x16xf32>
    %375 = arith.maximumf %352, %374 : vector<2x16xf32>
    %cst_11 = arith.constant 0.000000e+00 : f32
    %376 = vector.broadcast %cst_11 : f32 to vector<2x16xf32>
    %377 = arith.maximumf %355, %376 : vector<2x16xf32>
    %cst_12 = arith.constant 0.000000e+00 : f32
    %378 = vector.broadcast %cst_12 : f32 to vector<2x16xf32>
    %379 = arith.maximumf %358, %378 : vector<2x16xf32>
    %cst_13 = arith.constant 0.000000e+00 : f32
    %380 = vector.broadcast %cst_13 : f32 to vector<2x16xf32>
    %381 = arith.maximumf %361, %380 : vector<2x16xf32>
    %cst_14 = arith.constant 0.000000e+00 : f32
    %382 = vector.broadcast %cst_14 : f32 to vector<2x16xf32>
    %383 = arith.maximumf %364, %382 : vector<2x16xf32>
    %cst_15 = arith.constant 0.000000e+00 : f32
    %384 = vector.broadcast %cst_15 : f32 to vector<2x16xf32>
    %385 = arith.maximumf %367, %384 : vector<2x16xf32>
    %cst_16 = arith.constant 0.000000e+00 : f32
    %386 = vector.broadcast %cst_16 : f32 to vector<2x16xf32>
    %387 = arith.maximumf %370, %386 : vector<2x16xf32>
    %cst_17 = arith.constant 0.000000e+00 : f32
    %388 = vector.broadcast %cst_17 : f32 to vector<2x16xf32>
    %389 = arith.maximumf %373, %388 : vector<2x16xf32>
    %390 = vector.broadcast %152 : f32 to vector<2x16xf32>
    %391 = vector.broadcast %136 : f32 to vector<2x16xf32>
    %392 = vector.broadcast %72 : f32 to vector<2x16xf32>
    %393 = arith.mulf %375, %392 : vector<2x16xf32>
    %394 = arith.addf %391, %393 : vector<2x16xf32>
    %395 = vector.broadcast %73 : f32 to vector<2x16xf32>
    %396 = arith.mulf %377, %395 : vector<2x16xf32>
    %397 = arith.addf %394, %396 : vector<2x16xf32>
    %398 = vector.broadcast %74 : f32 to vector<2x16xf32>
    %399 = arith.mulf %379, %398 : vector<2x16xf32>
    %400 = arith.addf %397, %399 : vector<2x16xf32>
    %401 = vector.broadcast %75 : f32 to vector<2x16xf32>
    %402 = arith.mulf %381, %401 : vector<2x16xf32>
    %403 = arith.addf %400, %402 : vector<2x16xf32>
    %404 = vector.broadcast %76 : f32 to vector<2x16xf32>
    %405 = arith.mulf %383, %404 : vector<2x16xf32>
    %406 = arith.addf %403, %405 : vector<2x16xf32>
    %407 = vector.broadcast %77 : f32 to vector<2x16xf32>
    %408 = arith.mulf %385, %407 : vector<2x16xf32>
    %409 = arith.addf %406, %408 : vector<2x16xf32>
    %410 = vector.broadcast %78 : f32 to vector<2x16xf32>
    %411 = arith.mulf %387, %410 : vector<2x16xf32>
    %412 = arith.addf %409, %411 : vector<2x16xf32>
    %413 = vector.broadcast %79 : f32 to vector<2x16xf32>
    %414 = arith.mulf %389, %413 : vector<2x16xf32>
    %415 = arith.addf %412, %414 : vector<2x16xf32>
    %416 = arith.addf %415, %375 : vector<2x16xf32>
    %cst_18 = arith.constant 0.000000e+00 : f32
    %417 = vector.broadcast %cst_18 : f32 to vector<2x16xf32>
    %418 = arith.maximumf %416, %417 : vector<2x16xf32>
    %419 = vector.broadcast %144 : f32 to vector<2x16xf32>
    %420 = arith.mulf %418, %419 : vector<2x16xf32>
    %421 = arith.addf %390, %420 : vector<2x16xf32>
    %422 = vector.broadcast %137 : f32 to vector<2x16xf32>
    %423 = vector.broadcast %80 : f32 to vector<2x16xf32>
    %424 = arith.mulf %375, %423 : vector<2x16xf32>
    %425 = arith.addf %422, %424 : vector<2x16xf32>
    %426 = vector.broadcast %81 : f32 to vector<2x16xf32>
    %427 = arith.mulf %377, %426 : vector<2x16xf32>
    %428 = arith.addf %425, %427 : vector<2x16xf32>
    %429 = vector.broadcast %82 : f32 to vector<2x16xf32>
    %430 = arith.mulf %379, %429 : vector<2x16xf32>
    %431 = arith.addf %428, %430 : vector<2x16xf32>
    %432 = vector.broadcast %83 : f32 to vector<2x16xf32>
    %433 = arith.mulf %381, %432 : vector<2x16xf32>
    %434 = arith.addf %431, %433 : vector<2x16xf32>
    %435 = vector.broadcast %84 : f32 to vector<2x16xf32>
    %436 = arith.mulf %383, %435 : vector<2x16xf32>
    %437 = arith.addf %434, %436 : vector<2x16xf32>
    %438 = vector.broadcast %85 : f32 to vector<2x16xf32>
    %439 = arith.mulf %385, %438 : vector<2x16xf32>
    %440 = arith.addf %437, %439 : vector<2x16xf32>
    %441 = vector.broadcast %86 : f32 to vector<2x16xf32>
    %442 = arith.mulf %387, %441 : vector<2x16xf32>
    %443 = arith.addf %440, %442 : vector<2x16xf32>
    %444 = vector.broadcast %87 : f32 to vector<2x16xf32>
    %445 = arith.mulf %389, %444 : vector<2x16xf32>
    %446 = arith.addf %443, %445 : vector<2x16xf32>
    %447 = arith.addf %446, %377 : vector<2x16xf32>
    %cst_19 = arith.constant 0.000000e+00 : f32
    %448 = vector.broadcast %cst_19 : f32 to vector<2x16xf32>
    %449 = arith.maximumf %447, %448 : vector<2x16xf32>
    %450 = vector.broadcast %145 : f32 to vector<2x16xf32>
    %451 = arith.mulf %449, %450 : vector<2x16xf32>
    %452 = arith.addf %421, %451 : vector<2x16xf32>
    %453 = vector.broadcast %138 : f32 to vector<2x16xf32>
    %454 = vector.broadcast %88 : f32 to vector<2x16xf32>
    %455 = arith.mulf %375, %454 : vector<2x16xf32>
    %456 = arith.addf %453, %455 : vector<2x16xf32>
    %457 = vector.broadcast %89 : f32 to vector<2x16xf32>
    %458 = arith.mulf %377, %457 : vector<2x16xf32>
    %459 = arith.addf %456, %458 : vector<2x16xf32>
    %460 = vector.broadcast %90 : f32 to vector<2x16xf32>
    %461 = arith.mulf %379, %460 : vector<2x16xf32>
    %462 = arith.addf %459, %461 : vector<2x16xf32>
    %463 = vector.broadcast %91 : f32 to vector<2x16xf32>
    %464 = arith.mulf %381, %463 : vector<2x16xf32>
    %465 = arith.addf %462, %464 : vector<2x16xf32>
    %466 = vector.broadcast %92 : f32 to vector<2x16xf32>
    %467 = arith.mulf %383, %466 : vector<2x16xf32>
    %468 = arith.addf %465, %467 : vector<2x16xf32>
    %469 = vector.broadcast %93 : f32 to vector<2x16xf32>
    %470 = arith.mulf %385, %469 : vector<2x16xf32>
    %471 = arith.addf %468, %470 : vector<2x16xf32>
    %472 = vector.broadcast %94 : f32 to vector<2x16xf32>
    %473 = arith.mulf %387, %472 : vector<2x16xf32>
    %474 = arith.addf %471, %473 : vector<2x16xf32>
    %475 = vector.broadcast %95 : f32 to vector<2x16xf32>
    %476 = arith.mulf %389, %475 : vector<2x16xf32>
    %477 = arith.addf %474, %476 : vector<2x16xf32>
    %478 = arith.addf %477, %379 : vector<2x16xf32>
    %cst_20 = arith.constant 0.000000e+00 : f32
    %479 = vector.broadcast %cst_20 : f32 to vector<2x16xf32>
    %480 = arith.maximumf %478, %479 : vector<2x16xf32>
    %481 = vector.broadcast %146 : f32 to vector<2x16xf32>
    %482 = arith.mulf %480, %481 : vector<2x16xf32>
    %483 = arith.addf %452, %482 : vector<2x16xf32>
    %484 = vector.broadcast %139 : f32 to vector<2x16xf32>
    %485 = vector.broadcast %96 : f32 to vector<2x16xf32>
    %486 = arith.mulf %375, %485 : vector<2x16xf32>
    %487 = arith.addf %484, %486 : vector<2x16xf32>
    %488 = vector.broadcast %97 : f32 to vector<2x16xf32>
    %489 = arith.mulf %377, %488 : vector<2x16xf32>
    %490 = arith.addf %487, %489 : vector<2x16xf32>
    %491 = vector.broadcast %98 : f32 to vector<2x16xf32>
    %492 = arith.mulf %379, %491 : vector<2x16xf32>
    %493 = arith.addf %490, %492 : vector<2x16xf32>
    %494 = vector.broadcast %99 : f32 to vector<2x16xf32>
    %495 = arith.mulf %381, %494 : vector<2x16xf32>
    %496 = arith.addf %493, %495 : vector<2x16xf32>
    %497 = vector.broadcast %100 : f32 to vector<2x16xf32>
    %498 = arith.mulf %383, %497 : vector<2x16xf32>
    %499 = arith.addf %496, %498 : vector<2x16xf32>
    %500 = vector.broadcast %101 : f32 to vector<2x16xf32>
    %501 = arith.mulf %385, %500 : vector<2x16xf32>
    %502 = arith.addf %499, %501 : vector<2x16xf32>
    %503 = vector.broadcast %102 : f32 to vector<2x16xf32>
    %504 = arith.mulf %387, %503 : vector<2x16xf32>
    %505 = arith.addf %502, %504 : vector<2x16xf32>
    %506 = vector.broadcast %103 : f32 to vector<2x16xf32>
    %507 = arith.mulf %389, %506 : vector<2x16xf32>
    %508 = arith.addf %505, %507 : vector<2x16xf32>
    %509 = arith.addf %508, %381 : vector<2x16xf32>
    %cst_21 = arith.constant 0.000000e+00 : f32
    %510 = vector.broadcast %cst_21 : f32 to vector<2x16xf32>
    %511 = arith.maximumf %509, %510 : vector<2x16xf32>
    %512 = vector.broadcast %147 : f32 to vector<2x16xf32>
    %513 = arith.mulf %511, %512 : vector<2x16xf32>
    %514 = arith.addf %483, %513 : vector<2x16xf32>
    %515 = vector.broadcast %140 : f32 to vector<2x16xf32>
    %516 = vector.broadcast %104 : f32 to vector<2x16xf32>
    %517 = arith.mulf %375, %516 : vector<2x16xf32>
    %518 = arith.addf %515, %517 : vector<2x16xf32>
    %519 = vector.broadcast %105 : f32 to vector<2x16xf32>
    %520 = arith.mulf %377, %519 : vector<2x16xf32>
    %521 = arith.addf %518, %520 : vector<2x16xf32>
    %522 = vector.broadcast %106 : f32 to vector<2x16xf32>
    %523 = arith.mulf %379, %522 : vector<2x16xf32>
    %524 = arith.addf %521, %523 : vector<2x16xf32>
    %525 = vector.broadcast %107 : f32 to vector<2x16xf32>
    %526 = arith.mulf %381, %525 : vector<2x16xf32>
    %527 = arith.addf %524, %526 : vector<2x16xf32>
    %528 = vector.broadcast %108 : f32 to vector<2x16xf32>
    %529 = arith.mulf %383, %528 : vector<2x16xf32>
    %530 = arith.addf %527, %529 : vector<2x16xf32>
    %531 = vector.broadcast %109 : f32 to vector<2x16xf32>
    %532 = arith.mulf %385, %531 : vector<2x16xf32>
    %533 = arith.addf %530, %532 : vector<2x16xf32>
    %534 = vector.broadcast %110 : f32 to vector<2x16xf32>
    %535 = arith.mulf %387, %534 : vector<2x16xf32>
    %536 = arith.addf %533, %535 : vector<2x16xf32>
    %537 = vector.broadcast %111 : f32 to vector<2x16xf32>
    %538 = arith.mulf %389, %537 : vector<2x16xf32>
    %539 = arith.addf %536, %538 : vector<2x16xf32>
    %540 = arith.addf %539, %383 : vector<2x16xf32>
    %cst_22 = arith.constant 0.000000e+00 : f32
    %541 = vector.broadcast %cst_22 : f32 to vector<2x16xf32>
    %542 = arith.maximumf %540, %541 : vector<2x16xf32>
    %543 = vector.broadcast %148 : f32 to vector<2x16xf32>
    %544 = arith.mulf %542, %543 : vector<2x16xf32>
    %545 = arith.addf %514, %544 : vector<2x16xf32>
    %546 = vector.broadcast %141 : f32 to vector<2x16xf32>
    %547 = vector.broadcast %112 : f32 to vector<2x16xf32>
    %548 = arith.mulf %375, %547 : vector<2x16xf32>
    %549 = arith.addf %546, %548 : vector<2x16xf32>
    %550 = vector.broadcast %113 : f32 to vector<2x16xf32>
    %551 = arith.mulf %377, %550 : vector<2x16xf32>
    %552 = arith.addf %549, %551 : vector<2x16xf32>
    %553 = vector.broadcast %114 : f32 to vector<2x16xf32>
    %554 = arith.mulf %379, %553 : vector<2x16xf32>
    %555 = arith.addf %552, %554 : vector<2x16xf32>
    %556 = vector.broadcast %115 : f32 to vector<2x16xf32>
    %557 = arith.mulf %381, %556 : vector<2x16xf32>
    %558 = arith.addf %555, %557 : vector<2x16xf32>
    %559 = vector.broadcast %116 : f32 to vector<2x16xf32>
    %560 = arith.mulf %383, %559 : vector<2x16xf32>
    %561 = arith.addf %558, %560 : vector<2x16xf32>
    %562 = vector.broadcast %117 : f32 to vector<2x16xf32>
    %563 = arith.mulf %385, %562 : vector<2x16xf32>
    %564 = arith.addf %561, %563 : vector<2x16xf32>
    %565 = vector.broadcast %118 : f32 to vector<2x16xf32>
    %566 = arith.mulf %387, %565 : vector<2x16xf32>
    %567 = arith.addf %564, %566 : vector<2x16xf32>
    %568 = vector.broadcast %119 : f32 to vector<2x16xf32>
    %569 = arith.mulf %389, %568 : vector<2x16xf32>
    %570 = arith.addf %567, %569 : vector<2x16xf32>
    %571 = arith.addf %570, %385 : vector<2x16xf32>
    %cst_23 = arith.constant 0.000000e+00 : f32
    %572 = vector.broadcast %cst_23 : f32 to vector<2x16xf32>
    %573 = arith.maximumf %571, %572 : vector<2x16xf32>
    %574 = vector.broadcast %149 : f32 to vector<2x16xf32>
    %575 = arith.mulf %573, %574 : vector<2x16xf32>
    %576 = arith.addf %545, %575 : vector<2x16xf32>
    %577 = vector.broadcast %142 : f32 to vector<2x16xf32>
    %578 = vector.broadcast %120 : f32 to vector<2x16xf32>
    %579 = arith.mulf %375, %578 : vector<2x16xf32>
    %580 = arith.addf %577, %579 : vector<2x16xf32>
    %581 = vector.broadcast %121 : f32 to vector<2x16xf32>
    %582 = arith.mulf %377, %581 : vector<2x16xf32>
    %583 = arith.addf %580, %582 : vector<2x16xf32>
    %584 = vector.broadcast %122 : f32 to vector<2x16xf32>
    %585 = arith.mulf %379, %584 : vector<2x16xf32>
    %586 = arith.addf %583, %585 : vector<2x16xf32>
    %587 = vector.broadcast %123 : f32 to vector<2x16xf32>
    %588 = arith.mulf %381, %587 : vector<2x16xf32>
    %589 = arith.addf %586, %588 : vector<2x16xf32>
    %590 = vector.broadcast %124 : f32 to vector<2x16xf32>
    %591 = arith.mulf %383, %590 : vector<2x16xf32>
    %592 = arith.addf %589, %591 : vector<2x16xf32>
    %593 = vector.broadcast %125 : f32 to vector<2x16xf32>
    %594 = arith.mulf %385, %593 : vector<2x16xf32>
    %595 = arith.addf %592, %594 : vector<2x16xf32>
    %596 = vector.broadcast %126 : f32 to vector<2x16xf32>
    %597 = arith.mulf %387, %596 : vector<2x16xf32>
    %598 = arith.addf %595, %597 : vector<2x16xf32>
    %599 = vector.broadcast %127 : f32 to vector<2x16xf32>
    %600 = arith.mulf %389, %599 : vector<2x16xf32>
    %601 = arith.addf %598, %600 : vector<2x16xf32>
    %602 = arith.addf %601, %387 : vector<2x16xf32>
    %cst_24 = arith.constant 0.000000e+00 : f32
    %603 = vector.broadcast %cst_24 : f32 to vector<2x16xf32>
    %604 = arith.maximumf %602, %603 : vector<2x16xf32>
    %605 = vector.broadcast %150 : f32 to vector<2x16xf32>
    %606 = arith.mulf %604, %605 : vector<2x16xf32>
    %607 = arith.addf %576, %606 : vector<2x16xf32>
    %608 = vector.broadcast %143 : f32 to vector<2x16xf32>
    %609 = vector.broadcast %128 : f32 to vector<2x16xf32>
    %610 = arith.mulf %375, %609 : vector<2x16xf32>
    %611 = arith.addf %608, %610 : vector<2x16xf32>
    %612 = vector.broadcast %129 : f32 to vector<2x16xf32>
    %613 = arith.mulf %377, %612 : vector<2x16xf32>
    %614 = arith.addf %611, %613 : vector<2x16xf32>
    %615 = vector.broadcast %130 : f32 to vector<2x16xf32>
    %616 = arith.mulf %379, %615 : vector<2x16xf32>
    %617 = arith.addf %614, %616 : vector<2x16xf32>
    %618 = vector.broadcast %131 : f32 to vector<2x16xf32>
    %619 = arith.mulf %381, %618 : vector<2x16xf32>
    %620 = arith.addf %617, %619 : vector<2x16xf32>
    %621 = vector.broadcast %132 : f32 to vector<2x16xf32>
    %622 = arith.mulf %383, %621 : vector<2x16xf32>
    %623 = arith.addf %620, %622 : vector<2x16xf32>
    %624 = vector.broadcast %133 : f32 to vector<2x16xf32>
    %625 = arith.mulf %385, %624 : vector<2x16xf32>
    %626 = arith.addf %623, %625 : vector<2x16xf32>
    %627 = vector.broadcast %134 : f32 to vector<2x16xf32>
    %628 = arith.mulf %387, %627 : vector<2x16xf32>
    %629 = arith.addf %626, %628 : vector<2x16xf32>
    %630 = vector.broadcast %135 : f32 to vector<2x16xf32>
    %631 = arith.mulf %389, %630 : vector<2x16xf32>
    %632 = arith.addf %629, %631 : vector<2x16xf32>
    %633 = arith.addf %632, %389 : vector<2x16xf32>
    %cst_25 = arith.constant 0.000000e+00 : f32
    %634 = vector.broadcast %cst_25 : f32 to vector<2x16xf32>
    %635 = arith.maximumf %633, %634 : vector<2x16xf32>
    %636 = vector.broadcast %151 : f32 to vector<2x16xf32>
    %637 = arith.mulf %635, %636 : vector<2x16xf32>
    %638 = arith.addf %607, %637 : vector<2x16xf32>
    %639 = arith.index_cast %c0_i32_8 : i32 to index
    %c0_26 = arith.constant 0 : index
    %c0_27 = arith.constant 0 : index
    %640 = vector.load %arg7[%639, %c0_26, %c0_27] : memref<1x2x16xf32, #tpu.memory_space<vmem>>, vector<1x2x16xf32>
    %641 = vector.shape_cast %640 : vector<1x2x16xf32> to vector<2x16xf32>
    %642 = vector.shape_cast %638 : vector<2x16xf32> to vector<1x2x16xf32>
    tpu.vector_store %arg7[%639, %c0_26, %c0_27], %642 {strides = array<i32>} : memref<1x2x16xf32, #tpu.memory_space<vmem>>, vector<1x2x16xf32>,
    %c1_i32 = arith.constant 1 : i32
    %c0_28 = arith.constant 0 : index
    %c0_29 = arith.constant 0 : index
    %c0_30 = arith.constant 0 : index
    %643 = vector.load %arg7[%c0_28, %c0_29, %c0_30] : memref<1x2x16xf32, #tpu.memory_space<vmem>>, vector<1x2x16xf32>
    %644 = vector.shape_cast %643 : vector<1x2x16xf32> to vector<2x16xf32>
    %c0_31 = arith.constant 0 : index
    %c0_32 = arith.constant 0 : index
    %645 = vector.load %arg5[%c0_31, %c0_32] : memref<2x16xf32, #tpu.memory_space<vmem>>, vector<2x16xf32>
    tpu.vector_store %arg5[%c0_31, %c0_32], %644 {strides = array<i32>} : memref<2x16xf32, #tpu.memory_space<vmem>>, vector<2x16xf32>,
    return
  }
  func.func @transform_0(%arg0: i32, %arg1: i32) -> (i32, i32) {
    %c0_i32 = arith.constant 0 : i32
    return %arg0, %arg1 : i32, i32
  }
  func.func @transform_1(%arg0: i32, %arg1: i32) -> (i32, i32) {
    %c1_i32 = arith.constant 1 : i32
    %0 = arith.muli %arg1, %c1_i32 : i32
    %c1_i32_0 = arith.constant 1 : i32
    %1 = arith.subi %0, %c1_i32_0 : i32
    %c0_i32 = arith.constant 0 : i32
    %2 = arith.maxsi %1, %c0_i32 : i32
    %c0_i32_1 = arith.constant 0 : i32
    return %arg0, %2 : i32, i32
  }
  func.func @transform_2(%arg0: i32, %arg1: i32) -> i32 {
    %c0_i32 = arith.constant 0 : i32
    %c0_i32_0 = arith.constant 0 : i32
    return %c0_i32 : i32
  }
  func.func @transform_3(%arg0: i32, %arg1: i32) -> (i32, i32) {
    %c0_i32 = arith.constant 0 : i32
    return %arg0, %arg1 : i32, i32
  }
}

</mosaic_0001>

<bundles_post_ra>
// kernel: tpu_custom_call.1
= control target key start
LH: loop header
LB: loop body
LE: loop exit
PB: predicated region body
PF: predicated region fallthrough
CT: control target
= control target key end

     0   :  { %s2141_s0 = inlined_call_operand.hbm [shape: f32[2,16], index: 0, kind: input, shape index: {}]   ;;  %s2142_s1 = inlined_call_operand.vmem [shape: f32[2,16], index: 1, kind: input, shape index: {}]   ;;  %s2143_s2 = inlined_call_operand.vmem [shape: f32[153], index: 2, kind: input, shape index: {}]   ;;  %s2144_s3 = inlined_call_operand.hbm [shape: f32[2,16], index: 3, kind: output, shape index: {}]  }
   0x1   :  { %2201 = sst [smem:[#allocation61_spill]] %s2144_s3 }
   0x2   :  { %8 = vsyncpa [#allocation5], 0 }
   0x3   :  { %9 = vsyncpa [#allocation7], 0 }
   0x4   :  { %10 = vsyncpa [#allocation6], 0  ;;  %s39_s14 = sshll.u32 %s2143_s2, 4  ;;  %s1308_s15 = smov [#allocation4]   ;;  %s40_s14 = int_to_ptr.vmem [resolvable:$true] %s39_s14 }
   0x5   :  { %s17_s16 = sshll.u32 %s1308_s15, 4  ;;  %s1246_s1 = scalar_lea.hbm %s2141_s0, 32  ;;  %s18_s16 = int_to_ptr.vmem [resolvable:$true] %s17_s16 }
   0x6   :  { %p1247_p0 = scmp.ne.s32.totalorder %s2141_s0, %s1246_s1  ;;  %p1250_p1 = scmp.lt.u32.totalorder %s1246_s1, %s2141_s0 }
   0x8   :  { %p1252_p2 = pnand %p1250_p1, %p1247_p0 }
   0xa   :  { %1255 = shalt.err (!%p1252_p2)
}
   0xb   :  { %s1256_s23 = scalar_lea.vmem %s18_s16, 32  ;;  %p1261_p4 = scmp.lt.s32.totalorder %s18_s16, %s18_s16 }
   0xc   :  { %p1257_p3 = scmp.ne.s32.totalorder %s18_s16, %s1256_s23  ;;  %p1262_p5 = scmp.lt.s32.totalorder %s1256_s23, %s1256_s23 }
   0xe   :  { %p1263_p6 = por %p1262_p5, %p1261_p4 }
  0x10   :  { %p1264_p7 = pnand %p1263_p6, %p1257_p3 }
  0x12   :  { %1267 = shalt.err (!%p1264_p7)
}
  0x13   :  { %20 = dma.hbm_to_vmem [thread:$0]  %s2141_s0, 32, %s18_s16, [#allocation5]  }
  0x14   :  { %s1268_s25 = scalar_lea.vmem %s40_s14, 32  ;;  %p1273_p9 = scmp.lt.s32.totalorder %s40_s14, %s40_s14 }
  0x15   :  { %p1269_p8 = scmp.ne.s32.totalorder %s40_s14, %s1268_s25  ;;  %p1274_p10 = scmp.lt.s32.totalorder %s1268_s25, %s1268_s25 }
  0x17   :  { %p1275_p11 = por %p1274_p10, %p1273_p9 }
  0x19   :  { %p1276_p12 = pnand %p1275_p11, %p1269_p8 }
  0x1b   :  { %1279 = shalt.err (!%p1276_p12)
}
  0x1c   :  { %s1309_s26 = smov [#allocation8]  }
  0x1d   :  { %42 = dma.vmem_to_smem %s40_s14, 32, %s1309_s26, [#allocation7]  }
  0x1e   :  { %1302 = dma.done.wait [#allocation5], 32  }
  0x1f   :  { %1303 = vsyncadd [#allocation5], 4294967264 }
  0x20   :  { %1304 = dma.done.wait [#allocation7], 32  }
  0x21   :  { %1305 = vsyncadd [#allocation7], 4294967264 }
  0x22   :  { %49 = sfence }
  0x23   :  { %s1081_s27 = sld [smem:[#allocation8 + $0x2]]  ;;  %v243_v0 = vld [vmem:[#allocation4] sm:$0x3]  ;;  %vm244_vm0 = vcmask 123904   ;;  %v1310_v1 = vmov 0.0   ;;  %s1080_s0 = sld [smem:[#allocation8 + $0x1]] }
  0x24   :  { %224 = vst [vmem:[#allocation2] sm:$0x3] %v1310_v1  ;;  %245 = vst.msk [vmem:[#allocation2 + $0x2] sm:$0x3] %vm244_vm0, %v243_v0  ;;  %s1096_s28 = sld [smem:[#allocation8 + $0x11]]  ;;  %s1082_s30 = sld [smem:[#allocation8 + $0x3]] }
  0x25   :  { %s1088_s29 = sld [smem:[#allocation8 + $0x9]]  ;;  %s1089_s4 = sld [smem:[#allocation8 + $0xa]]  ;;  %vm285_vm1 = vcmask 1039360   ;;  %vm358_vm2 = vcmask 1031168   ;;  %vm431_vm3 = vcmask 1022976   ;;  %vm504_vm4 = vcmask 1014784  }
  0x26   :  { %s1097_s5 = sld [smem:[#allocation8 + $0x12]]  ;;  %s1104_s6 = sld [smem:[#allocation8 + $0x19]]  ;;  %vm577_vm5 = vcmask 1006592   ;;  %vm650_vm6 = vcmask 998400   ;;  %vm723_vm7 = vcmask 990208   ;;  %vm1052_vm8 = vcmask 64512  }
  0x27   :  { %s1311_s7 = smov 126   ;;  %s1312_s8 = smov 127  }
  0x28   :  { %s1083_s9 = sld [smem:[#allocation8 + $0x4]]  ;;  %s1090_s10 = sld [smem:[#allocation8 + $0xb]] }
  0x29   :  { %v352_v2 = vstv %s1081_s27  ;;  %v279_v3 = vstv %s1080_s0  ;;  %s1105_s11 = sld [smem:[#allocation8 + $0x1a]]  ;;  %s1112_s12 = sld [smem:[#allocation8 + $0x21]] }
  0x2a   :  { %v298_v5 = vstv %s1096_s28  ;;  %v425_v11 = vstv %s1082_s30  ;;  %s1313_s13 = smov 125   ;;  %s1091_s14 = sld [smem:[#allocation8 + $0xc]] }
  0x2b   :  { %v1357_v4 = vld [vmem:[#allocation2] sm:$0xf]  ;;  %v289_v8 = vstv %s1088_s29  ;;  %v362_v12 = vstv %s1089_s4  ;;  %s1098_s15 = sld [smem:[#allocation8 + $0x13]]  ;;  %s1120_s16 = sld [smem:[#allocation8 + $0x29]] }
  0x2c   :  { %v353_v6 = vmul.f32 %v352_v2, %v1357_v4  ;;  %v280_v7 = vmul.f32 %v279_v3, %v1357_v4  ;;  %v299_v9 = vmul.f32 %v298_v5, %v1357_v4  ;;  %v290_v10 = vmul.f32 %v289_v8, %v1357_v4  ;;  %s1084_s17 = sld [smem:[#allocation8 + $0x5]]  ;;  %s1314_s18 = smov 124  }
  0x2d   :  { %v426_v13 = vmul.f32 %v425_v11, %v1357_v4  ;;  %v363_v14 = vmul.f32 %v362_v12, %v1357_v4  ;;  %v371_v15 = vstv %s1097_s5  ;;  %v307_v16 = vstv %s1104_s6  ;;  %s1106_s1 = sld [smem:[#allocation8 + $0x1b]]  ;;  %s1113_s19 = sld [smem:[#allocation8 + $0x22]] }
  0x2e   :  { %355 = vrot.lane.b32.xlu1 %v353_v6, %s1311_s7  ;;  %282 = vrot.lane.b32.xlu0 %v280_v7, %s1312_s8  ;;  %v372_v17 = vmul.f32 %v371_v15, %v1357_v4  ;;  %v308_v18 = vmul.f32 %v307_v16, %v1357_v4  ;;  %v498_v19 = vstv %s1083_s9  ;;  %v435_v20 = vstv %s1090_s10  ;;  %s1092_s20 = sld [smem:[#allocation8 + $0xd]]  ;;  %s1099_s21 = sld [smem:[#allocation8 + $0x14]] }
  0x2f   :  { %v499_v21 = vmul.f32 %v498_v19, %v1357_v4  ;;  %v436_v22 = vmul.f32 %v435_v20, %v1357_v4  ;;  %v380_v23 = vstv %s1105_s11  ;;  %v316_v24 = vstv %s1112_s12  ;;  %s1128_s22 = sld [smem:[#allocation8 + $0x31]]  ;;  %s1085_s23 = sld [smem:[#allocation8 + $0x6]] }
  0x30   :  { %v381_v25 = vmul.f32 %v380_v23, %v1357_v4  ;;  %v317_v26 = vmul.f32 %v316_v24, %v1357_v4  ;;  %v508_v27 = vstv %s1091_s14  ;;  %s1315_s2 = smov 123   ;;  %s1114_s24 = sld [smem:[#allocation8 + $0x23]] }
  0x31   :  { %v444_v28 = vstv %s1098_s15  ;;  %v509_v29 = vmul.f32 %v508_v27, %v1357_v4  ;;  %v325_v31 = vstv %s1120_s16  ;;  %s1121_s25 = sld [smem:[#allocation8 + $0x2a]]  ;;  %s1100_s26 = sld [smem:[#allocation8 + $0x15]] }
  0x32   :  { %301 = vrot.lane.b32.xlu1 %v299_v9, %s1312_s8  ;;  %292 = vrot.lane.b32.xlu0 %v290_v10, %s1312_s8  ;;  %v445_v30 = vmul.f32 %v444_v28, %v1357_v4  ;;  %v571_v32 = vstv %s1084_s17  ;;  %v326_v33 = vmul.f32 %v325_v31, %v1357_v4  ;;  %s1107_s27 = sld [smem:[#allocation8 + $0x1c]]  ;;  %s1086_s0 = sld [smem:[#allocation8 + $0x7]] }
  0x33   :  { %v572_v34 = vmul.f32 %v571_v32, %v1357_v4  ;;  %v453_v35 = vstv %s1106_s1  ;;  %v389_v36 = vstv %s1113_s19  ;;  %s1093_s28 = sld [smem:[#allocation8 + $0xe]]  ;;  %s1316_s29 = smov 122  }
  0x34   :  { %v454_v37 = vmul.f32 %v453_v35, %v1357_v4  ;;  %v390_v38 = vmul.f32 %v389_v36, %v1357_v4  ;;  %v581_v39 = vstv %s1092_s20  ;;  %v517_v40 = vstv %s1099_s21  ;;  %s1129_s30 = sld [smem:[#allocation8 + $0x32]]  ;;  %s1136_s4 = sld [smem:[#allocation8 + $0x39]] }
  0x35   :  { %v582_v41 = vmul.f32 %v581_v39, %v1357_v4  ;;  %v518_v42 = vmul.f32 %v517_v40, %v1357_v4  ;;  %v334_v43 = vstv %s1128_s22  ;;  %v644_v44 = vstv %s1085_s23  ;;  %s1115_s5 = sld [smem:[#allocation8 + $0x24]]  ;;  %s1122_s6 = sld [smem:[#allocation8 + $0x2b]] }
  0x36   :  { %428 = vrot.lane.b32.xlu1 %v426_v13, %s1313_s13  ;;  %365 = vrot.lane.b32.xlu0 %v363_v14, %s1311_s7  ;;  %v335_v45 = vmul.f32 %v334_v43, %v1357_v4  ;;  %v645_v46 = vmul.f32 %v644_v44, %v1357_v4  ;;  %v462_v47 = vstv %s1114_s24  ;;  %s1101_s9 = sld [smem:[#allocation8 + $0x16]]  ;;  %s1108_s10 = sld [smem:[#allocation8 + $0x1d]] }
  0x37   :  { %v398_v48 = vstv %s1121_s25  ;;  %v463_v49 = vmul.f32 %v462_v47, %v1357_v4  ;;  %v590_v51 = vstv %s1100_s26  ;;  %s1317_s11 = smov 121   ;;  %s1137_s12 = sld [smem:[#allocation8 + $0x3a]] }
  0x38   :  { %v399_v50 = vmul.f32 %v398_v48, %v1357_v4  ;;  %v526_v52 = vstv %s1107_s27  ;;  %v591_v53 = vmul.f32 %v590_v51, %v1357_v4  ;;  %v717_v55 = vstv %s1086_s0  ;;  %s1094_s14 = sld [smem:[#allocation8 + $0xf]]  ;;  %s1123_s15 = sld [smem:[#allocation8 + $0x2c]] }
  0x39   :  { %v527_v54 = vmul.f32 %v526_v52, %v1357_v4  ;;  %v654_v56 = vstv %s1093_s28  ;;  %v718_v57 = vmul.f32 %v717_v55, %v1357_v4  ;;  %s1130_s16 = sld [smem:[#allocation8 + $0x33]]  ;;  %s1109_s17 = sld [smem:[#allocation8 + $0x1e]] }
  0x3a   :  { %374 = vrot.lane.b32.xlu1 %v372_v17, %s1311_s7  ;;  %310 = vrot.lane.b32.xlu0 %v308_v18, %s1312_s8  ;;  %v655_v58 = vmul.f32 %v654_v56, %v1357_v4  ;;  %v407_v59 = vstv %s1129_s30  ;;  %v343_v60 = vstv %s1136_s4  ;;  %s1138_s1 = sld [smem:[#allocation8 + $0x3b]]  ;;  %s1102_s19 = sld [smem:[#allocation8 + $0x17]] }
  0x3b   :  { %v408_v61 = vmul.f32 %v407_v59, %v1357_v4  ;;  %v344_v62 = vmul.f32 %v343_v60, %v1357_v4  ;;  %v535_v63 = vstv %s1115_s5  ;;  %v471_v0 = vstv %s1122_s6  ;;  %s1124_s20 = sld [smem:[#allocation8 + $0x2d]]  ;;  %s1131_s21 = sld [smem:[#allocation8 + $0x34]] }
  0x3c   :  { %v536_v1 = vmul.f32 %v535_v63, %v1357_v4  ;;  %v472_v2 = vmul.f32 %v471_v0, %v1357_v4  ;;  %v663_v3 = vstv %s1101_s9  ;;  %v599_v5 = vstv %s1108_s10  ;;  %s1117_s22 = sld [smem:[#allocation8 + $0x26]]  ;;  %s1132_s23 = sld [smem:[#allocation8 + $0x35]] }
  0x3d   :  { %v664_v6 = vmul.f32 %v663_v3, %v1357_v4  ;;  %v600_v7 = vmul.f32 %v599_v5, %v1357_v4  ;;  %v416_v8 = vstv %s1137_s12  ;;  %s1139_s24 = sld [smem:[#allocation8 + $0x3c]]  ;;  %s1118_s25 = sld [smem:[#allocation8 + $0x27]] }
  0x3e   :  { %501 = vrot.lane.b32.xlu1 %v499_v21, %s1314_s18  ;;  %438 = vrot.lane.b32.xlu0 %v436_v22, %s1313_s13  ;;  %v727_v9 = vstv %s1094_s14  ;;  %v417_v10 = vmul.f32 %v416_v8, %v1357_v4  ;;  %v544_v12 = vstv %s1123_s15  ;;  %s1125_s26 = sld [smem:[#allocation8 + $0x2e]]  ;;  %s1140_s27 = sld [smem:[#allocation8 + $0x3d]] }
  0x3f   :  { %v728_v11 = vmul.f32 %v727_v9, %v1357_v4  ;;  %v480_v13 = vstv %s1130_s16  ;;  %v545_v14 = vmul.f32 %v544_v12, %v1357_v4  ;;  %v672_v16 = vstv %s1109_s17  ;;  %s1141_s0 = sld [smem:[#allocation8 + $0x3e]]  ;;  %s1126_s28 = sld [smem:[#allocation8 + $0x2f]] }
  0x40   :  { %v481_v15 = vmul.f32 %v480_v13, %v1357_v4  ;;  %v673_v18 = vmul.f32 %v672_v16, %v1357_v4  ;;  %v489_v20 = vstv %s1138_s1  ;;  %v736_v21 = vstv %s1102_s19  ;;  %s1142_s30 = sld [smem:[#allocation8 + $0x3f]]  ;;  %s67_s5 = sld [smem:[#allocation8]] }
  0x41   :  { %v490_v22 = vmul.f32 %v489_v20, %v1357_v4  ;;  %v737_v23 = vmul.f32 %v736_v21, %v1357_v4  ;;  %v617_v24 = vstv %s1124_s20  ;;  %s1134_s4 = sld [smem:[#allocation8 + $0x37]]  ;;  %s1095_s6 = sld [smem:[#allocation8 + $0x10]] }
  0x42   :  { %383 = vrot.lane.b32.xlu1 %v381_v25, %s1311_s7  ;;  %319 = vrot.lane.b32.xlu0 %v317_v26, %s1312_s8  ;;  %v553_v25 = vstv %s1131_s21  ;;  %v618_v26 = vmul.f32 %v617_v24, %v1357_v4  ;;  %v626_v32 = vstv %s1132_s23  ;;  %s1087_s9 = sld [smem:[#allocation8 + $0x8]]  ;;  %s1145_s10 = sld [smem:[#allocation8 + $0x42]] }
  0x43   :  { %v554_v27 = vmul.f32 %v553_v25, %v1357_v4  ;;  %v754_v36 = vstv %s1118_s25  ;;  %s1472_s12 = sld [smem:[#allocation8 + $0x18]]  ;;  %s1147_s14 = sld [smem:[#allocation8 + $0x44]] }
  0x44   :  { %s1490_s15 = sld [smem:[#allocation8 + $0x28]]  ;;  %s1495_s16 = sld [smem:[#allocation8 + $0x45]] }
  0x45   :  { %v708_v44 = vstv %s1141_s0  ;;  %s1499_s17 = sld [smem:[#allocation8 + $0x30]]  ;;  %s1506_s19 = sld [smem:[#allocation8 + $0x47]] }
  0x46   :  { %511 = vrot.lane.b32.xlu1 %v509_v29, %s1314_s18  ;;  %447 = vrot.lane.b32.xlu0 %v445_v30, %s1313_s13  ;;  %v681_v29 = vstv %s1117_s22  ;;  %v781_v48 = vstv %s1142_s30  ;;  %s1504_s1 = sld [smem:[#allocation8 + $0x38]]  ;;  %s1536_s0 = sld [smem:[#allocation8 + $0x8a]] }
  0x47   :  { %v682_v31 = vmul.f32 %v681_v29, %v1357_v4  ;;  %v255_v52 = vstv %s67_s5  ;;  %v261_v55 = vstv %s1095_s6  ;;  %s1508_s20 = sld [smem:[#allocation8 + $0x48]]  ;;  %s1544_s30 = sld [smem:[#allocation8 + $0x8c]] }
  0x48   :  { %v258_v56 = vstv %s1087_s9  ;;  %v262_v60 = vmul.f32 %v261_v55, %v1357_v4  ;;  %v249_v0 = vstv %s1145_s10  ;;  %s1512_s21 = sld [smem:[#allocation8 + $0x50]]  ;;  %s1548_s5 = sld [smem:[#allocation8 + $0x8e]] }
  0x49   :  { %v264_v12 = vstv %s1472_s12  ;;  %s1519_s22 = sld [smem:[#allocation8 + $0x60]]  ;;  %s1552_s6 = sld [smem:[#allocation8 + $0x8f]] }
  0x4a   :  { %328 = vrot.lane.b32.xlu1 %v326_v33, %s1312_s8  ;;  %574 = vrot.lane.b32.xlu0 %v572_v34, %s1315_s2  ;;  %v562_v33 = vstv %s1139_s24  ;;  %v627_v34 = vmul.f32 %v626_v32, %v1357_v4  ;;  %v263_v5 = vadd.f32 %v262_v60, %v249_v0  ;;  %v265_v20 = vmul.f32 %v264_v12, %v1357_v4  ;;  %s1521_s23 = sld [smem:[#allocation8 + $0x68]]  ;;  %s1556_s9 = sld [smem:[#allocation8 + $0x51]] }
  0x4b   :  { %v563_v35 = vmul.f32 %v562_v33, %v1357_v4  ;;  %s1524_s24 = sld [smem:[#allocation8 + $0x70]]  ;;  %s1558_s10 = sld [smem:[#allocation8 + $0x59]] }
  0x4c   :  { %s1526_s25 = sld [smem:[#allocation8 + $0x78]]  ;;  %2212 = sst [smem:[#allocation23_spill]] %s1536_s0 }
  0x4d   :  { %2202 = sst [smem:[#allocation13_spill]] %s1508_s20  ;;  %s1568_s12 = sld [smem:[#allocation8 + $0x69]] }
  0x4e   :  { %456 = vrot.lane.b32.xlu1 %v454_v37, %s1313_s13  ;;  %392 = vrot.lane.b32.xlu0 %v390_v38, %s1311_s7  ;;  %v690_v37 = vstv %s1125_s26  ;;  %v755_v38 = vmul.f32 %v754_v36, %v1357_v4  ;;  %2203 = sst [smem:[#allocation14_spill]] %s1512_s21  ;;  %s1528_s26 = sld [smem:[#allocation8 + $0x80]] }
  0x4f   :  { %v691_v39 = vmul.f32 %v690_v37, %v1357_v4  ;;  %2205 = sst [smem:[#allocation16_spill]] %s1519_s22  ;;  %s1581_s3 = sld [smem:[#allocation8 + $0x5a]] }
  0x50   :  { %2206 = sst [smem:[#allocation17_spill]] %s1521_s23 }
  0x51   :  { %2207 = sst [smem:[#allocation18_spill]] %s1524_s24 }
  0x52   :  { %584 = vrot.lane.b32.xlu1 %v582_v41, %s1315_s2  ;;  %520 = vrot.lane.b32.xlu0 %v518_v42, %s1314_s18  ;;  %v635_v41 = vstv %s1140_s27  ;;  %2208 = sst [smem:[#allocation19_spill]] %s1526_s25  ;;  %s1534_s27 = sld [smem:[#allocation8 + $0x89]] }
  0x53   :  { %v636_v43 = vmul.f32 %v635_v41, %v1357_v4  ;;  %2214 = sst [smem:[#allocation25_spill]] %s1544_s30 }
  0x54   :  { %2209 = sst [smem:[#allocation20_spill]] %s1528_s26 }
  0x55   :  { %2216 = sst [smem:[#allocation27_spill]] %s1548_s5 }
  0x56   :  { %337 = vrot.lane.b32.xlu1 %v335_v45, %s1312_s8  ;;  %647 = vrot.lane.b32.xlu0 %v645_v46, %s1316_s29  ;;  %v763_v45 = vstv %s1126_s28  ;;  %v709_v46 = vmul.f32 %v708_v44, %v1357_v4  ;;  %s1542_s28 = sld [smem:[#allocation8 + $0x8b]]  ;;  %2218 = sst [smem:[#allocation29_spill]] %s1552_s6 }
  0x57   :  { %v764_v47 = vmul.f32 %v763_v45, %v1357_v4  ;;  %2219 = sst [smem:[#allocation30_spill]] %s1558_s10 }
  0x58   :  { %2211 = sst [smem:[#allocation22_spill]] %s1534_s27 }
  0x59   :  { %2221 = sst [smem:[#allocation32_spill]] %s1568_s12 }
  0x5a   :  { %465 = vrot.lane.b32.xlu1 %v463_v49, %s1313_s13  ;;  %401 = vrot.lane.b32.xlu0 %v399_v50, %s1311_s7  ;;  %v772_v49 = vstv %s1134_s4  ;;  %v782_v50 = vmul.f32 %v781_v48, %v1357_v4  ;;  %s1546_s4 = sld [smem:[#allocation8 + $0x8d]]  ;;  %2227 = sst [smem:[#allocation38_spill]] %s1581_s3 }
  0x5b   :  { %v773_v51 = vmul.f32 %v772_v49, %v1357_v4  ;;  %s1601_s3 = sld [smem:[#allocation8 + $0x82]]  ;;  %s1605_s12 = sld [smem:[#allocation8 + $0x53]] }
  0x5c   :  { %2213 = sst [smem:[#allocation24_spill]] %s1542_s28 }
  0x5e   :  { %593 = vrot.lane.b32.xlu1 %v591_v53, %s1315_s2  ;;  %529 = vrot.lane.b32.xlu0 %v527_v54, %s1314_s18  ;;  %v256_v53 = vmul.f32 %v255_v52, %v1357_v4 }
  0x60   :  { %2215 = sst [smem:[#allocation26_spill]] %s1546_s4 }
  0x61   :  { %2233 = sst [smem:[#allocation44_spill]] %s1601_s3  ;;  %s1617_s3 = sld [smem:[#allocation8 + $0x6b]] }
  0x62   :  { %720 = vrot.lane.b32.xlu1 %v718_v57, %s1317_s11  ;;  %657 = vrot.lane.b32.xlu0 %v655_v58, %s1316_s29  ;;  %2234 = sst [smem:[#allocation45_spill]] %s1605_s12  ;;  %s1623_s12 = sld [smem:[#allocation8 + $0x4c]] }
  0x66   :  { %410 = vrot.lane.b32.xlu1 %v408_v61, %s1311_s7  ;;  %346 = vrot.lane.b32.xlu0 %v344_v62, %s1312_s8  ;;  %s1116_s8 = sld [smem:[#allocation8 + $0x25]]  ;;  %v259_v61 = vmul.f32 %v258_v56, %v1357_v4 }
  0x67   :  { %2237 = sst [smem:[#allocation48_spill]] %s1617_s3  ;;  %s1633_s3 = sld [smem:[#allocation8 + $0x5c]] }
  0x6a   :  { %538 = vrot.lane.b32.xlu1 %v536_v1, %s1314_s18  ;;  %474 = vrot.lane.b32.xlu0 %v472_v2, %s1313_s13 }
  0x6c   :  { %v608_v17 = vstv %s1116_s8  ;;  %s1502_s8 = sld [smem:[#allocation8 + $0x46]] }
  0x6d   :  { %v609_v19 = vmul.f32 %v608_v17, %v1357_v4  ;;  %2241 = sst [smem:[#allocation52_spill]] %s1633_s3  ;;  %s1648_s3 = sld [smem:[#allocation8 + $0x74]] }
  0x6e   :  { %666 = vrot.lane.b32.xlu1 %v664_v6, %s1316_s29  ;;  %602 = vrot.lane.b32.xlu0 %v600_v7, %s1315_s2 }
  0x72   :  { %419 = vrot.lane.b32.xlu1 %v417_v10, %s1311_s7  ;;  %730 = vrot.lane.b32.xlu0 %v728_v11, %s1317_s11  ;;  %s1110_s7 = sld [smem:[#allocation8 + $0x1f]] }
  0x76   :  { %547 = vrot.lane.b32.xlu1 %v545_v14, %s1314_s18  ;;  %483 = vrot.lane.b32.xlu0 %v481_v15, %s1313_s13 }
  0x78   :  { %v745_v28 = vstv %s1110_s7  ;;  %s1514_s7 = sld [smem:[#allocation8 + $0x58]] }
  0x79   :  { %v746_v30 = vmul.f32 %v745_v28, %v1357_v4 }
  0x7a   :  { %675 = vrot.lane.b32.xlu1 %v673_v18, %s1316_s29  ;;  %611 = vrot.lane.b32.xlu0 %v609_v19, %s1315_s2 }
  0x7e   :  { %492 = vrot.lane.b32.xlu1 %v490_v22, %s1313_s13  ;;  %739 = vrot.lane.b32.xlu0 %v737_v23, %s1317_s11  ;;  %s1133_s13 = sld [smem:[#allocation8 + $0x36]]  ;;  %2204 = sst [smem:[#allocation15_spill]] %s1514_s7 }
  0x82   :  { %620 = vrot.lane.b32.xlu1 %v618_v26, %s1315_s2  ;;  %556 = vrot.lane.b32.xlu0 %v554_v27, %s1314_s18 }
  0x84   :  { %v699_v40 = vstv %s1133_s13  ;;  %s1530_s13 = sld [smem:[#allocation8 + $0x88]] }
  0x85   :  { %v700_v42 = vmul.f32 %v699_v40, %v1357_v4 }
  0x86   :  { %748 = vrot.lane.b32.xlu1 %v746_v30, %s1317_s11  ;;  %684 = vrot.lane.b32.xlu0 %v682_v31, %s1316_s29 }
  0x8a   :  { %629 = vrot.lane.b32.xlu1 %v627_v34, %s1315_s2  ;;  %565 = vrot.lane.b32.xlu0 %v563_v35, %s1314_s18  ;;  %s1143_s18 = sld [smem:[#allocation8 + $0x40]] }
  0x8b   :  { %2210 = sst [smem:[#allocation21_spill]] %s1530_s13 }
  0x8e   :  { %757 = vrot.lane.b32.xlu1 %v755_v38, %s1317_s11  ;;  %693 = vrot.lane.b32.xlu0 %v691_v39, %s1316_s29 }
  0x90   :  { %v247_v54 = vstv %s1143_s18  ;;  %s1550_s18 = sld [smem:[#allocation8 + $0x49]] }
  0x91   :  { %v257_v59 = vadd.f32 %v256_v53, %v247_v54  ;;  %v270_v53 = vstv %s1490_s15  ;;  %s1576_s15 = sld [smem:[#allocation8 + $0x81]] }
  0x92   :  { %702 = vrot.lane.b32.xlu1 %v700_v42, %s1316_s29  ;;  %638 = vrot.lane.b32.xlu0 %v636_v43, %s1315_s2  ;;  %s1144_s2 = sld [smem:[#allocation8 + $0x41]]  ;;  %v251_v43 = vstv %s1147_s14  ;;  %v271_v60 = vmul.f32 %v270_v53, %v1357_v4  ;;  %s1574_s14 = sld [smem:[#allocation8 + $0x4a]] }
  0x96   :  { %711 = vrot.lane.b32.xlu1 %v709_v46, %s1316_s29  ;;  %766 = vrot.lane.b32.xlu0 %v764_v47, %s1317_s11  ;;  %s1476_s29 = sld [smem:[#allocation8 + $0x43]]  ;;  %2217 = sst [smem:[#allocation28_spill]] %s1550_s18 }
  0x97   :  { %2225 = sst [smem:[#allocation36_spill]] %s1576_s15  ;;  %s1595_s15 = sld [smem:[#allocation8 + $0x72]] }
  0x98   :  { %v248_v1 = vstv %s1144_s2  ;;  %s1566_s2 = sld [smem:[#allocation8 + $0x61]]  ;;  %2224 = sst [smem:[#allocation35_spill]] %s1574_s14 }
  0x99   :  { %v260_v7 = vadd.f32 %v259_v61, %v248_v1  ;;  %s1597_s14 = sld [smem:[#allocation8 + $0x7a]] }
  0x9a   :  { %784 = vrot.lane.b32.xlu1 %v782_v50, %s1317_s11  ;;  %775 = vrot.lane.b32.xlu0 %v773_v51, %s1317_s11  ;;  %s1481_s11 = sld [smem:[#allocation8 + $0x20]] }
  0x9c   :  { %v250_v23 = vstv %s1476_s29  ;;  %s1570_s29 = sld [smem:[#allocation8 + $0x71]] }
  0x9d   :  { %v266_v29 = vadd.f32 %v265_v20, %v250_v23  ;;  %2230 = sst [smem:[#allocation41_spill]] %s1595_s15  ;;  %s1621_s15 = sld [smem:[#allocation8 + $0x7b]] }
  0x9e   :  { %2220 = sst [smem:[#allocation31_spill]] %s1566_s2  ;;  %v893_v53 = vstv %s1566_s2  ;;  %s1700_s2 = sld [smem:[#allocation8 + $0x57]] }
  0x9f   :  { %2231 = sst [smem:[#allocation42_spill]] %s1597_s14  ;;  %s1619_s14 = sld [smem:[#allocation8 + $0x73]] }
  0xa0   :  { %v356_v57 = vpop.permute.xlu1 %355  ;;  %v283_v58 = vpop.permute.xlu0 %282  ;;  %v267_v33 = vstv %s1481_s11  ;;  %s1572_s11 = sld [smem:[#allocation8 + $0x79]] }
  0xa1   :  { %v357_v62 = vrot.slane %v356_v57, 2  ;;  %v284_v63 = vrot.slane %v283_v58, 2  ;;  %v268_v40 = vmul.f32 %v267_v33, %v1357_v4  ;;  %v830_v33 = vstv %s1512_s21  ;;  %s1658_s21 = sld [smem:[#allocation8 + $0x84]] }
  0xa2   :  { %2222 = sst [smem:[#allocation33_spill]] %s1570_s29  ;;  %s1593_s29 = sld [smem:[#allocation8 + $0x6a]] }
  0xa3   :  { %v286_v2 = vsel %vm285_vm1, %v283_v58, %v284_v63  ;;  %v359_v9 = vsel %vm358_vm2, %v356_v57, %v357_v62  ;;  %v269_v49 = vadd.f32 %v268_v40, %v251_v43  ;;  %v252_v63 = vstv %s1495_s16  ;;  %s1579_s16 = sld [smem:[#allocation8 + $0x52]]  ;;  %2238 = sst [smem:[#allocation49_spill]] %s1621_s15 }
  0xa4   :  { %v288_v3 = vadd.f32 %v286_v2, %v257_v59  ;;  %v302_v6 = vpop.permute.xlu1 %301  ;;  %v293_v8 = vpop.permute.xlu0 %292  ;;  %s1640_s15 = sld [smem:[#allocation8 + $0x64]]  ;;  %v980_v40 = vstv %s1526_s25  ;;  %v919_v43 = vstv %s1544_s30 }
  0xa5   :  { %v303_v10 = vrot.slane %v302_v6, 2  ;;  %v294_v11 = vrot.slane %v293_v8, 2  ;;  %2258 = sst [smem:[#allocation57_spill]] %s1700_s2 }
  0xa6   :  { %v361_v13 = vadd.f32 %v359_v9, %v288_v3  ;;  %2223 = sst [smem:[#allocation34_spill]] %s1572_s11  ;;  %s1591_s11 = sld [smem:[#allocation8 + $0x62]] }
  0xa7   :  { %v304_v14 = vsel %vm285_vm1, %v302_v6, %v303_v10  ;;  %v295_v15 = vsel %vm285_vm1, %v293_v8, %v294_v11  ;;  %s2247_s25 = sld [smem:[#allocation34_spill]] }
  0xa8   :  { %v306_v16 = vadd.f32 %v304_v14, %v263_v5  ;;  %v297_v17 = vadd.f32 %v295_v15, %v260_v7  ;;  %v429_v18 = vpop.permute.xlu1 %428  ;;  %v366_v19 = vpop.permute.xlu0 %365  ;;  %v272_v5 = vadd.f32 %v271_v60, %v252_v63  ;;  %2229 = sst [smem:[#allocation40_spill]] %s1593_s29  ;;  %s1711_s29 = sld [smem:[#allocation8 + $0x5e]] }
  0xa9   :  { %v430_v21 = vrot.slane %v429_v18, 2  ;;  %v367_v22 = vrot.slane %v366_v19, 2  ;;  %2226 = sst [smem:[#allocation37_spill]] %s1579_s16  ;;  %s1599_s16 = sld [smem:[#allocation8 + $0x4b]] }
  0xab   :  { %v432_v24 = vsel %vm431_vm3, %v429_v18, %v430_v21  ;;  %v368_v25 = vsel %vm358_vm2, %v366_v19, %v367_v22  ;;  %v273_v21 = vstv %s1499_s17  ;;  %v276_v22 = vstv %s1504_s1  ;;  %s1607_s17 = sld [smem:[#allocation8 + $0x5b]] }
  0xac   :  { %v434_v26 = vadd.f32 %v432_v24, %v361_v13  ;;  %v370_v27 = vadd.f32 %v368_v25, %v297_v17  ;;  %v375_v28 = vpop.permute.xlu1 %374  ;;  %v311_v30 = vpop.permute.xlu0 %310  ;;  %2228 = sst [smem:[#allocation39_spill]] %s1591_s11  ;;  %v274_v23 = vmul.f32 %v273_v21, %v1357_v4  ;;  %v277_v24 = vmul.f32 %v276_v22, %v1357_v4  ;;  %s1615_s1 = sld [smem:[#allocation8 + $0x63]] }
  0xad   :  { %v376_v31 = vrot.slane %v375_v28, 2  ;;  %v312_v32 = vrot.slane %v311_v30, 2  ;;  %v253_v25 = vstv %s1502_s8  ;;  %s1625_s8 = sld [smem:[#allocation8 + $0x83]]  ;;  %s1746_s11 = sld [smem:[#allocation8 + $0x76]] }
  0xae   :  { %v1627_v4 = vadd.f32 %v274_v23, %v253_v25 }
  0xaf   :  { %v377_v34 = vsel %vm358_vm2, %v375_v28, %v376_v31  ;;  %v313_v35 = vsel %vm285_vm1, %v311_v30, %v312_v32  ;;  %2232 = sst [smem:[#allocation43_spill]] %s1599_s16  ;;  %v254_v28 = vstv %s1506_s19  ;;  %s1631_s19 = sld [smem:[#allocation8 + $0x54]]  ;;  %v800_v30 = vstv %s1508_s20 }
  0xb0   :  { %v379_v36 = vadd.f32 %v377_v34, %v306_v16  ;;  %v315_v37 = vadd.f32 %v313_v35, %v266_v29  ;;  %v502_v38 = vpop.permute.xlu1 %501  ;;  %v439_v39 = vpop.permute.xlu0 %438  ;;  %v1629_v29 = vadd.f32 %v277_v24, %v254_v28  ;;  %v860_v34 = vstv %s1514_s7  ;;  %s1650_s20 = sld [smem:[#allocation8 + $0x7c]]  ;;  %s1666_s7 = sld [smem:[#allocation8 + $0x5d]] }
  0xb1   :  { %v503_v41 = vrot.slane %v502_v38, 2  ;;  %v440_v42 = vrot.slane %v439_v39, 2  ;;  %2235 = sst [smem:[#allocation46_spill]] %s1607_s17  ;;  %v890_v35 = vstv %s1519_s22  ;;  %s1664_s22 = sld [smem:[#allocation8 + $0x55]] }
  0xb2   :  { %2236 = sst [smem:[#allocation47_spill]] %s1615_s1  ;;  %s1728_s17 = sld [smem:[#allocation8 + $0x6f]] }
  0xb3   :  { %v505_v44 = vsel %vm504_vm4, %v502_v38, %v503_v41  ;;  %v441_v45 = vsel %vm431_vm3, %v439_v39, %v440_v42  ;;  %2239 = sst [smem:[#allocation50_spill]] %s1625_s8  ;;  %s1642_s8 = sld [smem:[#allocation8 + $0x6c]]  ;;  %v829_v38 = vstv %s1534_s27  ;;  %v950_v39 = vstv %s1524_s24 }
  0xb4   :  { %v507_v46 = vadd.f32 %v505_v44, %v434_v26  ;;  %v443_v47 = vadd.f32 %v441_v45, %v370_v27  ;;  %v384_v48 = vpop.permute.xlu1 %383  ;;  %v320_v50 = vpop.permute.xlu0 %319  ;;  %v859_v41 = vstv %s1536_s0  ;;  %v889_v42 = vstv %s1542_s28  ;;  %s2246_s27 = sld [smem:[#allocation33_spill]]  ;;  %s2248_s24 = sld [smem:[#allocation36_spill]] }
  0xb5   :  { %v385_v51 = vrot.slane %v384_v48, 2  ;;  %v321_v52 = vrot.slane %v320_v50, 2  ;;  %2240 = sst [smem:[#allocation51_spill]] %s1631_s19  ;;  %v949_v44 = vstv %s1546_s4  ;;  %v803_v45 = vstv %s1550_s18  ;;  %s1676_s4 = sld [smem:[#allocation8 + $0x65]] }
  0xb6   :  { %2245 = sst [smem:[#allocation54_spill]] %s1666_s7  ;;  %s1678_s0 = sld [smem:[#allocation8 + $0x6d]] }
  0xb7   :  { %v386_v54 = vsel %vm358_vm2, %v384_v48, %v385_v51  ;;  %v322_v55 = vsel %vm285_vm1, %v320_v50, %v321_v52  ;;  %v1010_v48 = vstv %s1528_s26  ;;  %v833_v51 = vstv %s1556_s9  ;;  %s1686_s18 = sld [smem:[#allocation8 + $0x75]]  ;;  %s1713_s28 = sld [smem:[#allocation8 + $0x5f]] }
  0xb8   :  { %v1516_v56 = vadd.f32 %v386_v54, %v315_v37  ;;  %v324_v57 = vadd.f32 %v322_v55, %v269_v49  ;;  %v512_v58 = vpop.permute.xlu1 %511  ;;  %v448_v59 = vpop.permute.xlu0 %447  ;;  %v799_v37 = vstv %s1530_s13  ;;  %s2244_s13 = sld [smem:[#allocation35_spill]]  ;;  %v863_v52 = vstv %s1558_s10  ;;  %s1702_s10 = sld [smem:[#allocation8 + $0x7d]] }
  0xb9   :  { %v513_v61 = vrot.slane %v512_v58, 2  ;;  %v449_v62 = vrot.slane %v448_v59, 2  ;;  %2242 = sst [smem:[#allocation53_spill]] %s1642_s8  ;;  %s1656_s8 = sld [smem:[#allocation8 + $0x4d]] }
  0xba   :  { %s2264_s30 = sld [smem:[#allocation50_spill]]  ;;  %s2266_s16 = sld [smem:[#allocation53_spill]] }
  0xbb   :  { %v514_v0 = vsel %vm504_vm4, %v512_v58, %v513_v61  ;;  %v450_v1 = vsel %vm431_vm3, %v448_v59, %v449_v62  ;;  %2251 = sst [smem:[#allocation33_spill]] %s1676_s4  ;;  %v983_v58 = vstv %s2247_s25  ;;  %v1013_v59 = vstv %s2248_s24  ;;  %s1692_s4 = sld [smem:[#allocation8 + $0x4f]] }
  0xbc   :  { %v1538_v2 = vadd.f32 %v514_v0, %v443_v47  ;;  %v1540_v3 = vadd.f32 %v450_v1, %v379_v36  ;;  %v329_v6 = vpop.permute.xlu1 %328  ;;  %v575_v7 = vpop.permute.xlu0 %574  ;;  %v920_v36 = vstv %s1521_s23  ;;  %s2243_s23 = sld [smem:[#allocation32_spill]]  ;;  %v1009_v47 = vstv %s1552_s6  ;;  %2252 = sst [smem:[#allocation55_spill]] %s1678_s0 }
  0xbd   :  { %v330_v8 = vrot.slane %v329_v6, 2  ;;  %v576_v9 = vrot.slane %v575_v7, 2  ;;  %s1684_s6 = sld [smem:[#allocation8 + $0x4e]]  ;;  %s2261_s24 = sld [smem:[#allocation49_spill]] }
  0xbe   :  { %v806_v55 = vstv %s2244_s13  ;;  %s1694_s0 = sld [smem:[#allocation8 + $0x56]]  ;;  %2259 = sst [smem:[#allocation58_spill]] %s1702_s10 }
  0xbf   :  { %v331_v10 = vsel %vm285_vm1, %v329_v6, %v330_v8  ;;  %v578_v11 = vsel %vm577_vm5, %v575_v7, %v576_v9  ;;  %s2260_s13 = sld [smem:[#allocation48_spill]]  ;;  %2265 = sst [smem:[#allocation49_spill]] %s1713_s28  ;;  %v878_v6 = vstv %s1711_s29 }
  0xc0   :  { %v1560_v12 = vadd.f32 %v331_v10, %v272_v5  ;;  %v1562_v13 = vadd.f32 %v578_v11, %v507_v46  ;;  %v1564_v14 = vpop.permute.xlu1 %456  ;;  %v393_v15 = vpop.permute.xlu0 %392  ;;  %v979_v46 = vstv %s1548_s5  ;;  %2263 = sst [smem:[#allocation48_spill]] %s1711_s29  ;;  %s1718_s5 = sld [smem:[#allocation8 + $0x66]]  ;;  %v881_v5 = vstv %s1713_s28 }
  0xc1   :  { %v394_v16 = vrot.slane %v393_v15, 2  ;;  %s1720_s7 = sld [smem:[#allocation8 + $0x67]]  ;;  %s1726_s26 = sld [smem:[#allocation8 + $0x6e]]  ;;  %v458_v0 = vrot.slane %v1564_v14, 2 }
  0xc2   :  { %v923_v54 = vstv %s2243_s23  ;;  %2270 = sst [smem:[#allocation60_spill]] %s1728_s17  ;;  %s2271_s1 = sld [smem:[#allocation54_spill]] }
  0xc3   :  { %v395_v17 = vsel %vm358_vm2, %v393_v15, %v394_v16  ;;  %s2272_s23 = sld [smem:[#allocation33_spill]]  ;;  %s2273_s25 = sld [smem:[#allocation55_spill]] }
  0xc4   :  { %v1583_v18 = vadd.f32 %v395_v17, %v324_v57  ;;  %v1585_v19 = vpop.permute.xlu1 %584  ;;  %v1587_v20 = vpop.permute.xlu0 %520  ;;  %v953_v57 = vstv %s2246_s27  ;;  %2256 = sst [smem:[#allocation56_spill]] %s1694_s0  ;;  %s1748_s19 = sld [smem:[#allocation8 + $0x85]] }
  0xc5   :  { %2274 = sst [smem:[#allocation54_spill]] %s1746_s11  ;;  %v586_v25 = vrot.slane %v1585_v19, 2  ;;  %v522_v17 = vrot.slane %v1587_v20, 2  ;;  %s1871_s29 = sld [smem:[#allocation8 + $0x77]] }
  0xc6   :  { %2267 = sst [smem:[#allocation50_spill]] %s1718_s5  ;;  %v908_v63 = vstv %s1718_s5  ;;  %s1873_s10 = sld [smem:[#allocation8 + $0x7e]] }
  0xc7   :  { %2268 = sst [smem:[#allocation53_spill]] %s1720_s7  ;;  %v523_v16 = vsel %vm504_vm4, %v1587_v20, %v522_v17  ;;  %s2302_s7 = sld [smem:[#allocation40_spill]] }
  0xc8   :  { %v1610_v26 = vpop.permute.xlu1 %337  ;;  %v1612_v27 = vpop.permute.xlu0 %647  ;;  %2269 = sst [smem:[#allocation59_spill]] %s1726_s26  ;;  %s2299_s0 = sld [smem:[#allocation37_spill]] }
  0xc9   :  { %v649_v7 = vrot.slane %v1612_v27, 2  ;;  %v339_v11 = vrot.slane %v1610_v26, 2  ;;  %s2300_s26 = sld [smem:[#allocation38_spill]]  ;;  %s2307_s5 = sld [smem:[#allocation42_spill]] }
  0xca   :  { %2275 = sst [smem:[#allocation33_spill]] %s1748_s19  ;;  %v1025_v17 = vstv %s1748_s19  ;;  %s2301_s19 = sld [smem:[#allocation39_spill]] }
  0xcb   :  { %v651_v22 = vsel %vm650_vm6, %v1612_v27, %v649_v7  ;;  %s2309_s28 = sld [smem:[#allocation44_spill]]  ;;  %s2313_s2 = sld [smem:[#allocation43_spill]] }
  0xcc   :  { %v1636_v31 = vpop.permute.xlu1 %465  ;;  %v1638_v32 = vpop.permute.xlu0 %401  ;;  %v653_v21 = vadd.f32 %v651_v22, %v1562_v13  ;;  %v459_v13 = vsel %vm431_vm3, %v1564_v14, %v458_v0  ;;  %v587_v22 = vsel %vm577_vm5, %v1585_v19, %v586_v25  ;;  %v968_v0 = vstv %s1746_s11  ;;  %s2303_s11 = sld [smem:[#allocation41_spill]]  ;;  %s2314_s9 = sld [smem:[#allocation45_spill]] }
  0xcd   :  { %v403_v24 = vrot.slane %v1638_v32, 2  ;;  %s2315_s17 = sld [smem:[#allocation46_spill]]  ;;  %s2316_s27 = sld [smem:[#allocation47_spill]] }
  0xcf   :  { %v404_v19 = vsel %vm358_vm2, %v1638_v32, %v403_v24 }
  0xd0   :  { %v1672_v49 = vpop.permute.xlu1 %593  ;;  %v1674_v50 = vpop.permute.xlu0 %529  ;;  %v406_v24 = vadd.f32 %v404_v19, %v1560_v12 }
  0xd1   :  { %v595_v61 = vrot.slane %v1672_v49, 2  ;;  %v531_v60 = vrot.slane %v1674_v50, 2 }
  0xd4   :  { %v721_v8 = vpop.permute.xlu1 %720  ;;  %v1709_v9 = vpop.permute.xlu0 %657 }
  0xd5   :  { %v722_v23 = vrot.slane %v721_v8, 2  ;;  %v659_v7 = vrot.slane %v1709_v9, 2 }
  0xd7   :  { %v724_v28 = vsel %vm723_vm7, %v721_v8, %v722_v23  ;;  %v467_v8 = vrot.slane %v1636_v31, 2 }
  0xd8   :  { %v1739_v10 = vpop.permute.xlu1 %410  ;;  %v1741_v1 = vpop.permute.xlu0 %346  ;;  %v726_v15 = vadd.f32 %v724_v28, %v653_v21  ;;  %v340_v21 = vsel %vm285_vm1, %v1610_v26, %v339_v11  ;;  %v461_v26 = vadd.f32 %v459_v13, %v1516_v56  ;;  %v525_v11 = vadd.f32 %v523_v16, %v1540_v3 }
  0xd9   :  { %v468_v28 = vsel %vm431_vm3, %v1636_v31, %v467_v8  ;;  %v589_v31 = vadd.f32 %v587_v22, %v1538_v2  ;;  %v348_v25 = vrot.slane %v1741_v1, 2  ;;  %v1801_v8 = vadd.f32 %v340_v21, %v1627_v4 }
  0xda   :  { %v1792_v20 = vmax.f32 %v726_v15, 0.0  ;;  %v1804_v32 = vadd.f32 %v468_v28, %v1583_v18  ;;  %v660_v15 = vsel %vm650_vm6, %v1709_v9, %v659_v7  ;;  %v596_v2 = vsel %vm577_vm5, %v1672_v49, %v595_v61 }
  0xdb   :  { %v532_v3 = vsel %vm504_vm4, %v1674_v50, %v531_v60  ;;  %v412_v4 = vrot.slane %v1739_v10, 2  ;;  %v662_v7 = vadd.f32 %v660_v15, %v589_v31  ;;  %v349_v49 = vsel %vm285_vm1, %v1741_v1, %v348_v25 }
  0xdc   :  { %v539_v23 = vpop.permute.xlu1 %538  ;;  %v475_v27 = vpop.permute.xlu0 %474  ;;  %v801_v9 = vmul.f32 %v800_v30, %v1792_v20  ;;  %v831_v12 = vmul.f32 %v830_v33, %v1792_v20  ;;  %v861_v50 = vmul.f32 %v860_v34, %v1792_v20  ;;  %v891_v60 = vmul.f32 %v890_v35, %v1792_v20 }
  0xdd   :  { %v476_v56 = vrot.slane %v475_v27, 2  ;;  %v540_v13 = vrot.slane %v539_v23, 2  ;;  %v921_v33 = vmul.f32 %v920_v36, %v1792_v20  ;;  %v951_v21 = vmul.f32 %v950_v39, %v1792_v20 }
  0xde   :  { %v598_v1 = vadd.f32 %v596_v2, %v525_v11  ;;  %v534_v28 = vadd.f32 %v532_v3, %v461_v26  ;;  %v413_v34 = vsel %vm358_vm2, %v1739_v10, %v412_v4  ;;  %v351_v31 = vadd.f32 %v349_v49, %v1629_v29 }
  0xdf   :  { %v477_v61 = vsel %vm431_vm3, %v475_v27, %v476_v56  ;;  %v541_v36 = vsel %vm504_vm4, %v539_v23, %v540_v13  ;;  %v802_v39 = vadd.f32 %v801_v9, %v799_v37  ;;  %v832_v11 = vadd.f32 %v831_v12, %v829_v38 }
  0xe0   :  { %v1786_v62 = vpop.permute.xlu1 %666  ;;  %v1788_v14 = vpop.permute.xlu0 %602  ;;  %v479_v25 = vadd.f32 %v477_v61, %v406_v24  ;;  %v862_v15 = vadd.f32 %v861_v50, %v859_v41  ;;  %v892_v10 = vadd.f32 %v891_v60, %v889_v42  ;;  %v922_v29 = vadd.f32 %v921_v33, %v919_v43 }
  0xe1   :  { %v668_v56 = vrot.slane %v1786_v62, 2  ;;  %v952_v23 = vadd.f32 %v951_v21, %v949_v44  ;;  %v981_v37 = vmul.f32 %v980_v40, %v1792_v20  ;;  %v604_v38 = vrot.slane %v1788_v14, 2 }
  0xe2   :  { %v1011_v43 = vmul.f32 %v1010_v48, %v1792_v20 }
  0xe3   :  { %v669_v13 = vsel %vm650_vm6, %v1786_v62, %v668_v56 }
  0xe4   :  { %v1814_v16 = vpop.permute.xlu1 %419  ;;  %v731_v18 = vpop.permute.xlu0 %730  ;;  %v671_v62 = vadd.f32 %v669_v13, %v598_v1 }
  0xe5   :  { %v732_v22 = vrot.slane %v731_v18, 2  ;;  %v421_v44 = vrot.slane %v1814_v16, 2 }
  0xe7   :  { %v733_v30 = vsel %vm723_vm7, %v731_v18, %v732_v22  ;;  %v422_v33 = vsel %vm358_vm2, %v1814_v16, %v421_v44  ;;  %v971_v16 = vstv %s1871_s29  ;;  %s2094_s29 = sld [smem:[#allocation8 + $0x94]] }
  0xe8   :  { %v735_v35 = vadd.f32 %v733_v30, %v662_v7  ;;  %v548_v27 = vpop.permute.xlu1 %547  ;;  %v484_v19 = vpop.permute.xlu0 %483  ;;  %v1012_v30 = vadd.f32 %v1011_v43, %v1009_v47 }
  0xe9   :  { %v549_v3 = vrot.slane %v548_v27, 2  ;;  %v485_v12 = vrot.slane %v484_v19, 2 }
  0xea   :  { %v1846_v26 = vmax.f32 %v735_v35, 0.0 }
  0xeb   :  { %v550_v21 = vsel %vm504_vm4, %v548_v27, %v549_v3  ;;  %v486_v47 = vsel %vm431_vm3, %v484_v19, %v485_v12  ;;  %v998_v27 = vstv %s1873_s10  ;;  %s2102_s10 = sld [smem:[#allocation8 + $0x95]] }
  0xec   :  { %v676_v24 = vpop.permute.xlu1 %675  ;;  %v612_v2 = vpop.permute.xlu0 %611  ;;  %v804_v41 = vmul.f32 %v803_v45, %v1846_v26  ;;  %v834_v42 = vmul.f32 %v833_v51, %v1846_v26  ;;  %v864_v40 = vmul.f32 %v863_v52, %v1846_v26  ;;  %v894_v45 = vmul.f32 %v893_v53, %v1846_v26 }
  0xed   :  { %v924_v48 = vmul.f32 %v923_v54, %v1846_v26  ;;  %v954_v18 = vmul.f32 %v953_v57, %v1846_v26  ;;  %v982_v52 = vadd.f32 %v981_v37, %v979_v46  ;;  %v677_v53 = vrot.slane %v676_v24, 2 }
  0xee   :  { %v805_v4 = vadd.f32 %v804_v41, %v802_v39  ;;  %v835_v51 = vadd.f32 %v834_v42, %v832_v11  ;;  %v865_v22 = vadd.f32 %v864_v40, %v862_v15  ;;  %v895_v9 = vadd.f32 %v894_v45, %v892_v10 }
  0xef   :  { %v925_v50 = vadd.f32 %v924_v48, %v922_v29  ;;  %v955_v60 = vadd.f32 %v954_v18, %v952_v23  ;;  %v984_v54 = vmul.f32 %v983_v58, %v1846_v26  ;;  %v1014_v57 = vmul.f32 %v1013_v59, %v1846_v26 }
  0xf0   :  { %v493_v7 = vpop.permute.xlu1 %492  ;;  %v740_v49 = vpop.permute.xlu0 %739  ;;  %v605_v46 = vsel %vm577_vm5, %v1788_v14, %v604_v38  ;;  %v613_v35 = vrot.slane %v612_v2, 2  ;;  %v678_v59 = vsel %vm650_vm6, %v676_v24, %v677_v53  ;;  %v415_v14 = vadd.f32 %v413_v34, %v1801_v8 }
  0xf1   :  { %v741_v61 = vrot.slane %v740_v49, 2  ;;  %v985_v58 = vadd.f32 %v984_v54, %v982_v52  ;;  %v1015_v11 = vadd.f32 %v1014_v57, %v1012_v30  ;;  %v494_v1 = vrot.slane %v493_v7, 2 }
  0xf2   :  { %v607_v29 = vadd.f32 %v605_v46, %v534_v28  ;;  %v543_v23 = vadd.f32 %v541_v36, %v1804_v32  ;;  %v424_v37 = vadd.f32 %v422_v33, %v351_v31  ;;  %v552_v38 = vadd.f32 %v550_v21, %v479_v25 }
  0xf3   :  { %v742_v39 = vsel %vm723_vm7, %v740_v49, %v741_v61  ;;  %v488_v24 = vadd.f32 %v486_v47, %v415_v14  ;;  %v614_v42 = vsel %vm577_vm5, %v612_v2, %v613_v35  ;;  %v495_v28 = vsel %vm431_vm3, %v493_v7, %v494_v1 }
  0xf4   :  { %v744_v15 = vadd.f32 %v742_v39, %v671_v62  ;;  %v621_v10 = vpop.permute.xlu1 %620  ;;  %v557_v56 = vpop.permute.xlu0 %556  ;;  %v680_v41 = vadd.f32 %v678_v59, %v607_v29  ;;  %v2304_v31 = vstv %s2299_s0  ;;  %v2305_v40 = vstv %s2300_s26  ;;  %s1945_s0 = sld [smem:[#allocation8 + $0x7f]]  ;;  %s1947_s26 = sld [smem:[#allocation8 + $0x90]] }
  0xf5   :  { %v622_v8 = vrot.slane %v621_v10, 2  ;;  %v558_v34 = vrot.slane %v557_v56, 2  ;;  %v2306_v48 = vstv %s2301_s19  ;;  %v2308_v52 = vstv %s2302_s7  ;;  %s1979_s19 = sld [smem:[#allocation8 + $0x91]]  ;;  %s2113_s7 = sld [smem:[#allocation8 + $0x96]] }
  0xf6   :  { %v1911_v19 = vmax.f32 %v744_v15, 0.0  ;;  %v2311_v35 = vstv %s2307_s5  ;;  %v2312_v47 = vstv %s2309_s28  ;;  %s1319_s5 = smov 8   ;;  %s1320_s28 = smov [#allocation9]  }
  0xf7   :  { %v623_v7 = vsel %vm577_vm5, %v621_v10, %v622_v8  ;;  %v559_v30 = vsel %vm504_vm4, %v557_v56, %v558_v34 }
  0xf8   :  { %v749_v43 = vpop.permute.xlu1 %748  ;;  %v685_v44 = vpop.permute.xlu0 %684  ;;  %v807_v32 = vmul.f32 %v806_v55, %v1911_v19  ;;  %v837_v36 = vmul.f32 %v2304_v31, %v1911_v19  ;;  %v867_v45 = vmul.f32 %v2305_v40, %v1911_v19  ;;  %v897_v2 = vmul.f32 %v2306_v48, %v1911_v19 }
  0xf9   :  { %v750_v25 = vrot.slane %v749_v43, 2  ;;  %v686_v3 = vrot.slane %v685_v44, 2  ;;  %v927_v12 = vmul.f32 %v2308_v52, %v1911_v19  ;;  %v2310_v55 = vstv %s2303_s11  ;;  %s1230_s11 = sld [smem:[#allocation8 + $0x97]] }
  0xfa   :  { %v808_v18 = vadd.f32 %v807_v32, %v805_v4  ;;  %v838_v13 = vadd.f32 %v837_v36, %v835_v51  ;;  %v957_v53 = vmul.f32 %v2310_v55, %v1911_v19  ;;  %v868_v61 = vadd.f32 %v867_v45, %v865_v22 }
  0xfb   :  { %v751_v49 = vsel %vm723_vm7, %v749_v43, %v750_v25  ;;  %v898_v54 = vadd.f32 %v897_v2, %v895_v9  ;;  %v928_v46 = vadd.f32 %v927_v12, %v925_v50  ;;  %v687_v33 = vsel %vm650_vm6, %v685_v44, %v686_v3 }
  0xfc   :  { %v753_v57 = vadd.f32 %v751_v49, %v680_v41  ;;  %v630_v62 = vpop.permute.xlu1 %629  ;;  %v566_v4 = vpop.permute.xlu0 %565  ;;  %v958_v51 = vadd.f32 %v957_v53, %v955_v60  ;;  %v987_v39 = vmul.f32 %v2311_v35, %v1911_v19  ;;  %v1017_v59 = vmul.f32 %v2312_v47, %v1911_v19 }
  0xfd   :  { %v631_v21 = vrot.slane %v630_v62, 2  ;;  %v616_v22 = vadd.f32 %v614_v42, %v543_v23  ;;  %v497_v9 = vadd.f32 %v495_v28, %v424_v37  ;;  %v625_v1 = vadd.f32 %v623_v7, %v552_v38 }
  0xfe   :  { %v1943_v15 = vmax.f32 %v753_v57, 0.0  ;;  %v561_v50 = vadd.f32 %v559_v30, %v488_v24  ;;  %v567_v60 = vrot.slane %v566_v4, 2  ;;  %v988_v10 = vadd.f32 %v987_v39, %v985_v58 }
  0xff   :  { %v1018_v56 = vadd.f32 %v1017_v59, %v1015_v11  ;;  %v689_v14 = vadd.f32 %v687_v33, %v616_v22  ;;  %v632_v29 = vsel %vm577_vm5, %v630_v62, %v631_v21  ;;  %v2317_v38 = vstv %s2313_s2  ;;  %s1064_s2 = sshll.u32 %s1320_s28, 4  ;;  %s1065_s2 = int_to_ptr.vmem [resolvable:$true] %s1064_s2 }
 0x100   :  { %v758_v23 = vpop.permute.xlu1 %757  ;;  %v694_v37 = vpop.permute.xlu0 %693  ;;  %v810_v41 = vmul.f32 %v2317_v38, %v1943_v15  ;;  %v2318_v42 = vstv %s2314_s9  ;;  %v2319_v24 = vstv %s2315_s17  ;;  %v2320_v44 = vstv %s2316_s27  ;;  %s1280_s9 = scalar_lea.vmem %s1065_s2, 32  ;;  %p1285_p0 = scmp.lt.s32.totalorder %s1065_s2, %s1065_s2 }
 0x101   :  { %v840_v8 = vmul.f32 %v2318_v42, %v1943_v15  ;;  %v759_v28 = vrot.slane %v758_v23, 2  ;;  %v695_v34 = vrot.slane %v694_v37, 2  ;;  %v870_v43 = vmul.f32 %v2319_v24, %v1943_v15  ;;  %p1281_p13 = scmp.ne.s32.totalorder %s1065_s2, %s1280_s9  ;;  %p1286_p1 = scmp.lt.s32.totalorder %s1280_s9, %s1280_s9 }
 0x102   :  { %v900_v58 = vmul.f32 %v2320_v44, %v1943_v15  ;;  %v811_v11 = vadd.f32 %v810_v41, %v808_v18  ;;  %v2321_v31 = vstv %s2260_s13  ;;  %v2322_v25 = vstv %s1619_s14  ;;  %s2325_s13 = sld [smem:[#allocation51_spill]]  ;;  %s2326_s14 = sld [smem:[#allocation52_spill]] }
 0x103   :  { %v841_v32 = vadd.f32 %v840_v8, %v838_v13  ;;  %v930_v36 = vmul.f32 %v2321_v31, %v1943_v15  ;;  %v960_v3 = vmul.f32 %v2322_v25, %v1943_v15  ;;  %v568_v40 = vsel %vm504_vm4, %v566_v4, %v567_v60  ;;  %p1287_p2 = por %p1286_p1, %p1285_p0 }
 0x104   :  { %v760_v45 = vsel %vm723_vm7, %v758_v23, %v759_v28  ;;  %v871_v48 = vadd.f32 %v870_v43, %v868_v61  ;;  %v901_v2 = vadd.f32 %v900_v58, %v898_v54  ;;  %v696_v18 = vsel %vm650_vm6, %v694_v37, %v695_v34  ;;  %v703_v12 = vpop.permute.xlu1 %702  ;;  %v639_v13 = vpop.permute.xlu0 %638 }
 0x105   :  { %v762_v52 = vadd.f32 %v760_v45, %v689_v14  ;;  %v931_v55 = vadd.f32 %v930_v36, %v928_v46  ;;  %v961_v53 = vadd.f32 %v960_v3, %v958_v51  ;;  %v704_v7 = vrot.slane %v703_v12, 2  ;;  %p1288_p3 = pnand %p1287_p2, %p1281_p13 }
 0x106   :  { %v640_v49 = vrot.slane %v639_v13, 2  ;;  %v2323_v30 = vstv %s2261_s24  ;;  %v2324_v62 = vstv %s2264_s30  ;;  %v634_v61 = vadd.f32 %v632_v29, %v561_v50  ;;  %s2346_s30 = sld [smem:[#allocation53_spill]] }
 0x107   :  { %v990_v57 = vmul.f32 %v2323_v30, %v1943_v15  ;;  %v1020_v4 = vmul.f32 %v2324_v62, %v1943_v15  ;;  %v1977_v33 = vmax.f32 %v762_v52, 0.0  ;;  %v826_v54 = vstv %s1947_s26 }
 0x108   :  { %v1001_v46 = vstv %s1945_s0  ;;  %v570_v51 = vadd.f32 %v568_v40, %v497_v9  ;;  %v698_v21 = vadd.f32 %v696_v18, %v625_v1  ;;  %v705_v47 = vsel %vm650_vm6, %v703_v12, %v704_v7  ;;  %v712_v22 = vpop.permute.xlu1 %711  ;;  %v767_v50 = vpop.permute.xlu0 %766 }
 0x109   :  { %v991_v35 = vadd.f32 %v990_v57, %v988_v10  ;;  %v1021_v39 = vadd.f32 %v1020_v4, %v1018_v56  ;;  %v641_v59 = vsel %vm577_vm5, %v639_v13, %v640_v49  ;;  %v2327_v60 = vstv %s1623_s12  ;;  %s2348_s12 = sld [smem:[#allocation60_spill]] }
 0x10a   :  { %v813_v14 = vmul.f32 %v2327_v60, %v1977_v33  ;;  %v2328_v29 = vstv %s2325_s13  ;;  %v713_v37 = vrot.slane %v712_v22, 2  ;;  %v768_v38 = vrot.slane %v767_v50, 2 }
 0x10b   :  { %v843_v23 = vmul.f32 %v2328_v29, %v1977_v33  ;;  %v2329_v9 = vstv %s2326_s14  ;;  %v2330_v10 = vstv %s1640_s15  ;;  %v2331_v8 = vstv %s2266_s16  ;;  %s2054_s15 = sld [smem:[#allocation8 + $0x98]]  ;;  %s2076_s16 = sld [smem:[#allocation8 + $0x87]] }
 0x10c   :  { %v873_v1 = vmul.f32 %v2329_v9, %v1977_v33  ;;  %v903_v56 = vmul.f32 %v2330_v10, %v1977_v33  ;;  %v814_v41 = vadd.f32 %v813_v14, %v811_v11  ;;  %v933_v28 = vmul.f32 %v2331_v8, %v1977_v33  ;;  %v785_v3 = vpop.permute.xlu1 %784  ;;  %v776_v11 = vpop.permute.xlu0 %775 }
 0x10d   :  { %v844_v42 = vadd.f32 %v843_v23, %v841_v32  ;;  %v2332_v34 = vstv %s1648_s3  ;;  %v714_v43 = vsel %vm650_vm6, %v712_v22, %v713_v37  ;;  %v769_v44 = vsel %vm723_vm7, %v767_v50, %v768_v38  ;;  %s2337_s3 = sld [smem:[#allocation56_spill]] }
 0x10e   :  { %v963_v24 = vmul.f32 %v2332_v34, %v1977_v33  ;;  %v874_v58 = vadd.f32 %v873_v1, %v871_v48  ;;  %v904_v31 = vadd.f32 %v903_v56, %v901_v2  ;;  %v643_v36 = vadd.f32 %v641_v59, %v570_v51 }
 0x10f   :  { %v771_v25 = vadd.f32 %v769_v44, %v698_v21  ;;  %v934_v40 = vadd.f32 %v933_v28, %v931_v55  ;;  %v786_v45 = vrot.slane %v785_v3, 2  ;;  %v777_v52 = vrot.slane %v776_v11, 2 }
 0x110   :  { %v964_v32 = vadd.f32 %v963_v24, %v961_v53  ;;  %v2333_v18 = vstv %s1650_s20  ;;  %v2334_v13 = vstv %s1658_s21  ;;  %v707_v2 = vadd.f32 %v705_v47, %v634_v61  ;;  %s2339_s20 = sld [smem:[#allocation57_spill]] }
 0x111   :  { %v993_v12 = vmul.f32 %v2333_v18, %v1977_v33  ;;  %v1023_v48 = vmul.f32 %v2334_v13, %v1977_v33  ;;  %v716_v7 = vadd.f32 %v714_v43, %v643_v36  ;;  %v2011_v49 = vmax.f32 %v771_v25, 0.0 }
 0x112   :  { %v856_v55 = vstv %s1979_s19  ;;  %v787_v53 = vsel %vm723_vm7, %v785_v3, %v786_v45  ;;  %v778_v30 = vsel %vm723_vm7, %v776_v11, %v777_v52  ;;  %v2335_v21 = vstv %s1656_s8 }
 0x113   :  { %v994_v57 = vadd.f32 %v993_v12, %v991_v35  ;;  %v2016_v62 = vadd.f32 %v1023_v48, %v1021_v39  ;;  %v789_v4 = vadd.f32 %v787_v53, %v716_v7  ;;  %v780_v51 = vadd.f32 %v778_v30, %v707_v2 }
 0x114   :  { %v816_v59 = vmul.f32 %v2335_v21, %v2011_v49  ;;  %v2336_v61 = vstv %s1664_s22  ;;  %v2338_v22 = vstv %s2271_s1  ;;  %v2340_v60 = vstv %s2272_s23  ;;  %s2347_s23 = sld [smem:[#allocation59_spill]]  ;;  %s2087_s1 = sld [smem:[#allocation8 + $0x93]] }
 0x115   :  { %v846_v47 = vmul.f32 %v2336_v61, %v2011_v49  ;;  %v876_v50 = vmul.f32 %v2338_v22, %v2011_v49  ;;  %v906_v35 = vmul.f32 %v2340_v60, %v2011_v49  ;;  %v2341_v39 = vstv %s2273_s25 }
 0x116   :  { %v936_v14 = vmul.f32 %v2341_v39, %v2011_v49  ;;  %v2342_v29 = vstv %s1686_s18  ;;  %v2036_v37 = vmax.f32 %v789_v4, 0.0  ;;  %v2038_v38 = vmax.f32 %v780_v51, 0.0  ;;  %s2052_s18 = sld [smem:[#allocation8 + $0x86]] }
 0x117   :  { %v966_v23 = vmul.f32 %v2342_v29, %v2011_v49  ;;  %v817_v9 = vadd.f32 %v816_v59, %v814_v41  ;;  %v847_v1 = vadd.f32 %v846_v47, %v844_v42  ;;  %v877_v10 = vadd.f32 %v876_v50, %v874_v58 }
 0x118   :  { %v907_v56 = vadd.f32 %v906_v35, %v904_v31  ;;  %v937_v8 = vadd.f32 %v936_v14, %v934_v40  ;;  %v2349_v34 = vstv %s1684_s6  ;;  %v2350_v43 = vstv %s1692_s4  ;;  %s2354_s4 = sld [smem:[#allocation58_spill]]  ;;  %s2068_s6 = sld [smem:[#allocation8 + $0x92]] }
 0x119   :  { %v967_v28 = vadd.f32 %v966_v23, %v964_v32  ;;  %v819_v24 = vmul.f32 %v2349_v34, %v2038_v38  ;;  %v822_v44 = vmul.f32 %v2350_v43, %v2036_v37  ;;  %v2351_v36 = vstv %s2337_s3 }
 0x11a   :  { %v849_v25 = vmul.f32 %v2351_v36, %v2038_v38  ;;  %v2352_v3 = vstv %s2339_s20  ;;  %v879_v42 = vmul.f32 %v878_v6, %v2038_v38  ;;  %v882_v58 = vmul.f32 %v881_v5, %v2036_v37 }
 0x11b   :  { %v852_v41 = vmul.f32 %v2352_v3, %v2036_v37  ;;  %v909_v31 = vmul.f32 %v908_v63, %v2038_v38  ;;  %v2355_v11 = vstv %s2346_s30  ;;  %v820_v32 = vadd.f32 %v819_v24, %v817_v9 }
 0x11c   :  { %v912_v40 = vmul.f32 %v2355_v11, %v2036_v37  ;;  %v850_v45 = vadd.f32 %v849_v25, %v847_v1  ;;  %v2356_v52 = vstv %s2347_s23  ;;  %v2357_v6 = vstv %s2348_s12 }
 0x11d   :  { %v939_v18 = vmul.f32 %v2356_v52, %v2038_v38  ;;  %v942_v12 = vmul.f32 %v2357_v6, %v2036_v37  ;;  %v880_v5 = vadd.f32 %v879_v42, %v877_v10  ;;  %v910_v13 = vadd.f32 %v909_v31, %v907_v56 }
 0x11e   :  { %v969_v63 = vmul.f32 %v968_v0, %v2038_v38  ;;  %v972_v48 = vmul.f32 %v971_v16, %v2036_v37  ;;  %v823_v2 = vadd.f32 %v822_v44, %v820_v32  ;;  %v853_v7 = vadd.f32 %v852_v41, %v850_v45 }
 0x11f   :  { %v940_v53 = vadd.f32 %v939_v18, %v937_v8  ;;  %v2358_v30 = vstv %s2354_s4  ;;  %v883_v51 = vadd.f32 %v882_v58, %v880_v5  ;;  %v913_v21 = vadd.f32 %v912_v40, %v910_v13 }
 0x120   :  { %v996_v4 = vmul.f32 %v2358_v30, %v2011_v49  ;;  %v970_v59 = vadd.f32 %v969_v63, %v967_v28  ;;  %v999_v61 = vmul.f32 %v998_v27, %v2038_v38  ;;  %v824_v0 = vadd.f32 %v823_v2, %v1792_v20 }
 0x121   :  { %v854_v16 = vadd.f32 %v853_v7, %v1846_v26  ;;  %v943_v47 = vadd.f32 %v942_v12, %v940_v53  ;;  %v884_v50 = vadd.f32 %v883_v51, %v1911_v19  ;;  %v914_v60 = vadd.f32 %v913_v21, %v1943_v15 }
 0x122   :  { %v997_v22 = vadd.f32 %v996_v4, %v994_v57  ;;  %v973_v35 = vadd.f32 %v972_v48, %v970_v59  ;;  %v1002_v27 = vmul.f32 %v1001_v46, %v2036_v37  ;;  %v825_v39 = vmax.f32 %v824_v0, 0.0 }
 0x123   :  { %v855_v20 = vmax.f32 %v854_v16, 0.0  ;;  %v944_v26 = vadd.f32 %v943_v47, %v1977_v33  ;;  %v798_v57 = vstv %s2054_s15  ;;  %v1026_v19 = vmul.f32 %v1025_v17, %v2011_v49 }
 0x124   :  { %v1000_v14 = vadd.f32 %v999_v61, %v997_v22  ;;  %v974_v29 = vadd.f32 %v973_v35, %v2011_v49  ;;  %v1028_v15 = vstv %s2052_s18  ;;  %v827_v23 = vmul.f32 %v826_v54, %v825_v39 }
 0x125   :  { %v885_v46 = vmax.f32 %v884_v50, 0.0  ;;  %v886_v9 = vstv %s2068_s6  ;;  %v915_v33 = vmax.f32 %v914_v60, 0.0  ;;  %v1027_v10 = vadd.f32 %v1026_v19, %v2016_v62 }
 0x126   :  { %v1003_v1 = vadd.f32 %v1002_v27, %v1000_v14  ;;  %v1031_v56 = vstv %s2076_s16  ;;  %v828_v8 = vadd.f32 %v827_v23, %v798_v57  ;;  %v857_v28 = vmul.f32 %v856_v55, %v855_v20 }
 0x127   :  { %v1029_v17 = vmul.f32 %v1028_v15, %v2038_v38  ;;  %v916_v54 = vstv %s2087_s1  ;;  %v945_v49 = vmax.f32 %v944_v26, 0.0  ;;  %v887_v43 = vmul.f32 %v886_v9, %v885_v46 }
 0x128   :  { %v1004_v34 = vadd.f32 %v1003_v1, %v2038_v38  ;;  %v858_v24 = vadd.f32 %v857_v28, %v828_v8  ;;  %v1032_v36 = vmul.f32 %v1031_v56, %v2036_v37  ;;  %v946_v25 = vstv %s2094_s29 }
 0x129   :  { %v1030_v44 = vadd.f32 %v1029_v17, %v1027_v10  ;;  %v1318_v62 = vmov 1983009808   ;;  %v1043_v41 = vlaneseq  ;;  %v917_v55 = vmul.f32 %v916_v54, %v915_v33 }
 0x12a   :  { %v1041_v3 = vunpack.c.l.s4 %v1318_v62  ;;  %v888_v42 = vadd.f32 %v887_v43, %v858_v24  ;;  %v975_v58 = vmax.f32 %v974_v29, 0.0  ;;  %v976_v11 = vstv %s2102_s10 }
 0x12b   :  { %v1033_v31 = vadd.f32 %v1032_v36, %v1030_v44  ;;  %v947_v40 = vmul.f32 %v946_v25, %v945_v49  ;;  %v1005_v32 = vmax.f32 %v1004_v34, 0.0  ;;  %v1006_v52 = vstv %s2113_s7 }
 0x12c   :  { %v918_v38 = vadd.f32 %v917_v55, %v888_v42  ;;  %v1044_v18 = vshrl.u32 %v1043_v41, 7  ;;  %v977_v12 = vmul.f32 %v976_v11, %v975_v58  ;;  %v1042_v13 = vunpack.c.0.s8 %v1041_v3 }
 0x12d   :  { %v1034_v45 = vadd.f32 %v1033_v31, %v2036_v37  ;;  %v1036_v63 = vstv %s1230_s11  ;;  %v1007_v2 = vmul.f32 %v1006_v52, %v1005_v32 }
 0x12e   :  { %v948_v6 = vadd.f32 %v947_v40, %v918_v38  ;;  %v1045_v30 = vsub.s32 %v1042_v13, %v1044_v18 }
 0x12f   :  { %v1035_v5 = vmax.f32 %v1034_v45, 0.0 }
 0x130   :  { %v978_v48 = vadd.f32 %v977_v12, %v948_v6 }
 0x131   :  { %v1037_v53 = vmul.f32 %v1036_v63, %v1035_v5 }
 0x132   :  { %v1008_v7 = vadd.f32 %v1007_v2, %v978_v48 }
 0x134   :  { %v1038_v4 = vadd.f32 %v1037_v53, %v1008_v7 }
 0x136   :  { %v1046_v51 = vrot.slane %v1038_v4, %v1045_v30 }
 0x138   :  { %1048 = vrot.lane.b32.xlu0 %v1046_v51, %s1319_s5  ;;  %v1047_v21 = vcombine.high %v1046_v51, %v1046_v51 }
 0x13a   :  { %1050 = vrot.lane.b32.xlu1 %v1047_v21, %s1319_s5 }
 0x1aa   :  { %v1049_v37 = vpop.permute.xlu0 %1048 }
 0x1ac   :  { %v1051_v59 = vpop.permute.xlu1 %1050 }
 0x1ad   :  { %v1053_v61 = vsel %vm1052_vm8, %v1049_v37, %v1051_v59 }
 0x1ae   :  { %1055 = vst.msk [vmem:[#allocation3] sm:$0x3] %vm244_vm0, %v1053_v61 }
 0x1b5   :  { %v1056_v0 = vld [vmem:[#allocation3] sm:$0x3] }
 0x1b6   :  { %1057 = vst.msk [vmem:[#allocation9] sm:$0x3] %vm244_vm0, %v1056_v0 }
 0x1b7   :  { %1291 = shalt.err (!%p1288_p3)
}
 0x1b8   :  { %s2360_s0 = sld [smem:[#allocation61_spill]] }
 0x1be   :  { %s1292_s26 = scalar_lea.hbm %s2360_s0, 32 }
 0x1bf   :  { %p1293_p4 = scmp.ne.s32.totalorder %s2360_s0, %s1292_s26  ;;  %p1296_p5 = scmp.lt.u32.totalorder %s1292_s26, %s2360_s0 }
 0x1c1   :  { %p1298_p6 = pnand %p1296_p5, %p1293_p4 }
 0x1c3   :  { %1301 = shalt.err (!%p1298_p6)
}
 0x1c4   :  { %1067 = dma.vmem_to_hbm [thread:$0]  %s1065_s2, 32, %s2360_s0, [#allocation6]  }
 0x1c5   :  { %1306 = dma.done.wait [#allocation6], 32  }
 0x1c6   :  { %1307 = vsyncadd [#allocation6], 4294967264 }
 0x1c7   :  { %1071 = vsyncpa [#allocation5], 1 }
 0x1c8   :  { %1072 = vsyncpa [#allocation6], 1 }
 0x1c9   :  { %1073 = vsyncpa [#allocation7], 1 }

</bundles_post_ra>
